<compile_context>
chip_gen: v6e
topology: v6e:2x2x1
jax: 0.10.0
libtpu: 0.0.40
codegen_flags: <defaults>
</compile_context>

<pallas_src>
import functools

import jax
import jax.numpy as jnp
from jax import lax
from jax.experimental import pallas as pl
from jax.experimental.pallas import tpu as pltpu


def patch_merger_kernel(x_ref, q_ref, gamma_ref, beta_ref, o_ref,
                        m_sc, l_sc, acc_sc, *,
                        eps, bb, tn, n_tokens, scale, affine_dtype):
    # x_ref:      (bb, tn, D)  current (batch-group, token-tile)
    # q_ref:      (M, D)       learned queries
    # gamma/beta: (1, D)       LayerNorm affine parameters
    # o_ref:      (bb, M, D)   output block (resident across the token axis)
    # m_sc/l_sc:  (bb, M, 1)   online-softmax running max / sum   (f32 scratch)
    # acc_sc:     (bb, M, D)   online-softmax running accumulator (f32 scratch)
    n = pl.program_id(1)

    @pl.when(n == 0)
    def _init():
        m_sc[...] = jnp.full_like(m_sc, -jnp.inf)
        l_sc[...] = jnp.zeros_like(l_sc)
        acc_sc[...] = jnp.zeros_like(acc_sc)

    d = x_ref.shape[-1]
    x = x_ref[...].reshape(bb * tn, d)                 # (R, D), input dtype

    # --- LayerNorm stats via E[x], E[x^2]: both reductions issue from x
    #     back-to-back (no dependency-chained (R, D) centering pass). ---
    xf = x.astype(jnp.float32)
    s1 = jnp.sum(xf, axis=-1, keepdims=True)           # (R, 1)
    s2 = jnp.sum(xf * xf, axis=-1, keepdims=True)      # (R, 1)
    inv_d = jnp.float32(1.0 / d)
    mean = s1 * inv_d
    var = s2 * inv_d - mean * mean
    inv_std = lax.rsqrt(var + jnp.float32(eps))        # (R, 1)
    row_a = inv_std.astype(affine_dtype)               # per-row scale
    row_b = (-mean * inv_std).astype(affine_dtype)     # per-row shift

    gamma = gamma_ref[...].astype(affine_dtype)        # (1, D)
    beta = beta_ref[...].astype(affine_dtype)          # (1, D)
    # xn = ((x - mean) * inv_std) * gamma + beta, as two broadcasted mul/adds.
    xn = (x.astype(affine_dtype) * row_a + row_b) * gamma + beta
    xn_mm = xn.astype(x.dtype)                         # MXU operand in input dtype

    # --- similarity: ONE dot for the whole block, contracting over D
    #     (no xn.T materialization through the XLU). ---
    q = q_ref[...]                                     # (M, D), input dtype
    sim_all = lax.dot_general(
        q, xn_mm, dimension_numbers=(((1,), (1,)), ((), ())),
        preferred_element_type=jnp.float32)            # (M, bb*tn), f32
    sim_all = sim_all * jnp.float32(scale)             # exact; (M, *) is tiny

    # Static mask for the zero-padded token tail, if the tile does not divide N.
    if n_tokens % tn != 0:
        col = lax.broadcasted_iota(jnp.int32, (1, tn), 1)
        valid = (n * tn + col) < n_tokens              # (1, tn)
    else:
        valid = None

    # --- per-batch online-softmax update (small body; heavy LN/sim is above) ---
    for i in range(bb):
        sim = sim_all[:, i * tn:(i + 1) * tn]          # (M, tn) f32
        if valid is not None:
            sim = jnp.where(valid, sim, -jnp.inf)
        xn_i = xn_mm[i * tn:(i + 1) * tn, :]           # (tn, D)

        m_prev = m_sc[i]                                             # (M, 1)
        m_new = jnp.maximum(m_prev, jnp.max(sim, axis=-1, keepdims=True))
        alpha = jnp.exp(m_prev - m_new)                # rescale previous partials
        p = jnp.exp(sim - m_new)                       # (M, tn) f32, unnormalized
        l_sc[i] = alpha * l_sc[i] + jnp.sum(p, axis=-1, keepdims=True)
        acc_sc[i] = alpha * acc_sc[i] + jnp.dot(
            p.astype(xn_i.dtype), xn_i, preferred_element_type=jnp.float32)
        m_sc[i] = m_new

    @pl.when(n == pl.num_programs(1) - 1)
    def _finalize():
        # Exact divide: only bb*M denominator values, once per batch group.
        o_ref[...] = (acc_sc[...] / l_sc[...]).astype(o_ref.dtype)


def _tile_params():
    """Generation-aware knobs: (f32-equivalent token-tile cap, vmem limit)."""
    vmem_cap = 64 * 1024 * 1024            # conservative default (~v7x per-TC)
    try:
        info = pltpu.get_tpu_info()
        cap = getattr(info, "vmem_capacity_bytes", None)
        if cap:
            vmem_cap = int(cap)
    except Exception:
        pass
    if vmem_cap >= 96 * 1024 * 1024:       # v5e / v6e: 128 MiB physical VMEM
        return 6 * 1024 * 1024, 64 * 1024 * 1024
    return 3 * 1024 * 1024, 32 * 1024 * 1024   # v7x: 64 MiB per TensorCore


def _pick_bb(B, N, D, tile_cap_f32):
    """Batch elements per grid step: amortize the ~0.35us/step overhead when
    the per-batch tile is tiny, while keeping >=2 batch steps for megacore."""
    if B == 1 or N % 8 != 0:               # keep the in-kernel reshape aligned
        return 1
    per_batch_f32 = max(1, N * D * 4)
    if 2 * per_batch_f32 >= tile_cap_f32:
        return 1
    target = max(1, min(B // 2, 8, tile_cap_f32 // (2 * per_batch_f32)))
    bb = 1
    for cand in range(1, B + 1):
        if B % cand == 0 and cand <= target:
            bb = cand
    return bb


def _pick_tn(N, D, bb, tile_cap_f32):
    """Token-tile rows: largest multiple of 8 whose f32-equivalent footprint
    (bb*tn*D*4; the f32 LN temporaries dominate) fits the generation-aware
    cap.  The wrapper zero-pads the token axis and the kernel masks the tail,
    so tn never has to fall back to the whole (possibly huge) axis."""
    max_rows = max(8, tile_cap_f32 // max(1, D * 4))
    max_tn = max(8, (max_rows // max(1, bb)) // 8 * 8)
    if N <= max_tn:
        return N                           # whole axis: block dim == array dim
    if N % max_tn == 0:
        return max_tn
    t = max_tn                             # prefer an 8-aligned divisor (no pad)
    while t >= max(8, max_tn // 2):
        if N % t == 0 and t % 8 == 0:
            return t
        t -= 8
    return max_tn                          # padded + masked tail


def patch_merger(x, queries, gamma, beta, *, eps=1e-5,
                 block_n=None, block_b=None):
    """x: (B, N, D); queries: (M, D); gamma/beta: (1, D) -> (B, M, D)."""
    B, N, D = x.shape
    M, Dq = queries.shape
    assert Dq == D
    scale = float(D) ** -0.5

    tile_cap_f32, vmem_limit = _tile_params()
    bb = block_b if block_b is not None else _pick_bb(B, N, D, tile_cap_f32)
    assert B % bb == 0, "block_b must divide B"
    tn = block_n if block_n is not None else _pick_tn(N, D, bb, tile_cap_f32)

    # Pad the token axis to a multiple of tn; the kernel masks the padded tail.
    n_pad = -N % tn
    if n_pad:
        assert tn % 8 == 0, "padded token tile must be a multiple of 8"
        x = jnp.pad(x, ((0, 0), (0, n_pad), (0, 0)))
    N_pad = N + n_pad

    # Stats stay f32; the affine/cast chain runs in bf16 only for bf16 inputs
    # (native bf16 VALU on v6e/v7x; f32 inputs keep the full-precision path).
    affine_dtype = (jnp.bfloat16 if x.dtype == jnp.dtype(jnp.bfloat16)
                    else jnp.float32)

    kernel = functools.partial(
        patch_merger_kernel, eps=eps, bb=bb, tn=tn, n_tokens=N, scale=scale,
        affine_dtype=affine_dtype)

    # TODO(synk): when B // bb == 1 on v7x (2 TensorCores), split the token
    # axis across cores with per-core partial (m, l, acc) + a tiny combine;
    # with a single "parallel" batch step one core currently idles.
    grid = (B // bb, N_pad // tn)

    return pl.pallas_call(
        kernel,
        out_shape=jax.ShapeDtypeStruct((B, M, D), x.dtype),
        grid=grid,
        in_specs=[
            pl.BlockSpec((bb, tn, D), lambda b, n: (b, n, 0)),   # x tiles
            pl.BlockSpec((M, D), lambda b, n: (0, 0)),           # queries (shared)
            pl.BlockSpec((1, D), lambda b, n: (0, 0)),           # LN gamma
            pl.BlockSpec((1, D), lambda b, n: (0, 0)),           # LN beta
        ],
        out_specs=pl.BlockSpec((bb, M, D), lambda b, n: (b, 0, 0)),
        scratch_shapes=[
            pltpu.VMEM((bb, M, 1), jnp.float32),   # running max
            pltpu.VMEM((bb, M, 1), jnp.float32),   # running sum
            pltpu.VMEM((bb, M, D), jnp.float32),   # running accumulator
        ],
        compiler_params=pltpu.CompilerParams(
            dimension_semantics=("parallel", "arbitrary"),
            vmem_limit_bytes=vmem_limit,
        ),
    )(x, queries, gamma, beta)


def patch_merger_ref(x, queries, gamma, beta, eps=1e-5):
    """Pure-JAX reference with identical semantics (for verification)."""
    mean = jnp.mean(x, axis=-1, keepdims=True)
    var = jnp.mean((x - mean) ** 2, axis=-1, keepdims=True)
    xn = (x - mean) / jnp.sqrt(var + eps) * gamma + beta
    scale = x.shape[-1] ** -0.5
    sim = jnp.einsum("md,bnd->bmn", queries, xn) * scale
    attn = jax.nn.softmax(sim, axis=-1)
    return jnp.einsum("bmn,bnd->bmd", attn, xn)


if __name__ == "__main__":
    key = jax.random.PRNGKey(0)

    # (B, N, D, M, block_n, block_b) — lane-dense D; exercises multi-batch
    # grouping, multi-step online softmax, B=1 with a masked padded tail, and
    # a tiny D<128 toy shape.
    configs = [
        (4, 128, 128, 8, None, None),   # auto tiling: bb=2, single token tile
        (2, 256, 128, 8, 128, 1),       # explicit tiling: 2 online-softmax steps
        (1, 200, 64, 8, 128, None),     # B=1, N % tn != 0 -> pad + mask path
        (2, 16, 32, 8, None, None),     # tiny toy shape
    ]

    ok = True
    for (B, N, D, M, bn, bbatch) in configs:
        kx, kq, key = jax.random.split(key, 3)
        x = jax.random.normal(kx, (B, N, D), dtype=jnp.float32)
        queries = jax.random.normal(kq, (M, D), dtype=jnp.float32)
        gamma = jnp.ones((1, D), dtype=jnp.float32)    # nn.LayerNorm init
        beta = jnp.zeros((1, D), dtype=jnp.float32)

        out = patch_merger(x, queries, gamma, beta, block_n=bn, block_b=bbatch)
        out = jax.block_until_ready(out)
        ref = patch_merger_ref(x, queries, gamma, beta)

        assert out.shape == (B, M, D)
        ok = ok and bool(jnp.allclose(out, ref, atol=1e-3, rtol=1e-3))

    assert ok, "mismatch vs reference"
    print("KERNEL_OK")
</pallas_src>

<mosaic_0001>
module attributes {stable_mosaic.version = 11 : i64} {
  func.func @patch_merger_kernel(%arg0: i32, %arg1: i32, %arg2: memref<2x128x128xf32, #tpu.memory_space<vmem>>, %arg3: memref<8x128xf32, #tpu.memory_space<vmem>>, %arg4: memref<1x128xf32, #tpu.memory_space<vmem>>, %arg5: memref<1x128xf32, #tpu.memory_space<vmem>>, %arg6: memref<2x8x128xf32, #tpu.memory_space<vmem>>, %arg7: memref<2x8x1xf32, #tpu.memory_space<vmem>>, %arg8: memref<2x8x1xf32, #tpu.memory_space<vmem>>, %arg9: memref<2x8x128xf32, #tpu.memory_space<vmem>>) attributes {dimension_semantics = [#tpu.dimension_semantics<parallel>, #tpu.dimension_semantics<arbitrary>], iteration_bounds = array<i64: 2, 1>, scalar_prefetch = 0 : i64, scratch_operands = 3 : i64, tpu.core_type = #tpu.core_type<tc>, window_params = [{transform_indices = @transform_0, window_bounds = array<i64: 2, 128, 128>}, {pipeline_mode = #tpu.pipeline_mode<synchronous>, transform_indices = @transform_1, window_bounds = array<i64: 8, 128>}, {pipeline_mode = #tpu.pipeline_mode<synchronous>, transform_indices = @transform_2, window_bounds = array<i64: 1, 128>}, {pipeline_mode = #tpu.pipeline_mode<synchronous>, transform_indices = @transform_3, window_bounds = array<i64: 1, 128>}, {transform_indices = @transform_4, window_bounds = array<i64: 2, 8, 128>}]} {
    %c0_i32 = arith.constant 0 : i32
    %0 = arith.cmpi eq, %arg1, %c0_i32 : i32
    %1 = arith.extui %0 : i1 to i32
    %c0_i32_0 = arith.constant 0 : i32
    %2 = arith.cmpi ne, %1, %c0_i32_0 : i32
    scf.if %2 {
      %cst_59 = arith.constant 0xFF800000 : f32
      %105 = vector.broadcast %cst_59 : f32 to vector<2x8x1xf32>
      %c0_60 = arith.constant 0 : index
      %c0_61 = arith.constant 0 : index
      %c0_62 = arith.constant 0 : index
      %106 = vector.load %arg7[%c0_60, %c0_61, %c0_62] : memref<2x8x1xf32, #tpu.memory_space<vmem>>, vector<2x8x1xf32>
      tpu.vector_store %arg7[%c0_60, %c0_61, %c0_62], %105 {strides = array<i32>} : memref<2x8x1xf32, #tpu.memory_space<vmem>>, vector<2x8x1xf32>,
      %cst_63 = arith.constant 0.000000e+00 : f32
      %107 = vector.broadcast %cst_63 : f32 to vector<2x8x1xf32>
      %c0_64 = arith.constant 0 : index
      %c0_65 = arith.constant 0 : index
      %c0_66 = arith.constant 0 : index
      %108 = vector.load %arg8[%c0_64, %c0_65, %c0_66] : memref<2x8x1xf32, #tpu.memory_space<vmem>>, vector<2x8x1xf32>
      tpu.vector_store %arg8[%c0_64, %c0_65, %c0_66], %107 {strides = array<i32>} : memref<2x8x1xf32, #tpu.memory_space<vmem>>, vector<2x8x1xf32>,
      %cst_67 = arith.constant 0.000000e+00 : f32
      %109 = vector.broadcast %cst_67 : f32 to vector<2x8x128xf32>
      %c0_68 = arith.constant 0 : index
      %c0_69 = arith.constant 0 : index
      %c0_70 = arith.constant 0 : index
      %110 = vector.load %arg9[%c0_68, %c0_69, %c0_70] : memref<2x8x128xf32, #tpu.memory_space<vmem>>, vector<2x8x128xf32>
      tpu.vector_store %arg9[%c0_68, %c0_69, %c0_70], %109 {strides = array<i32>} : memref<2x8x128xf32, #tpu.memory_space<vmem>>, vector<2x8x128xf32>,
    } else {
    }
    %c0 = arith.constant 0 : index
    %c0_1 = arith.constant 0 : index
    %c0_2 = arith.constant 0 : index
    %3 = vector.load %arg2[%c0, %c0_1, %c0_2] : memref<2x128x128xf32, #tpu.memory_space<vmem>>, vector<2x128x128xf32>
    %4 = vector.shape_cast %3 : vector<2x128x128xf32> to vector<256x128xf32>
    %cst = arith.constant dense<0.000000e+00> : vector<256xf32>
    %5 = vector.multi_reduction <add>, %4, %cst [1] : vector<256x128xf32> to vector<256xf32>
    %6 = vector.shape_cast %5 : vector<256xf32> to vector<256x1xf32>
    %7 = arith.mulf %4, %4 : vector<256x128xf32>
    %cst_3 = arith.constant dense<0.000000e+00> : vector<256xf32>
    %8 = vector.multi_reduction <add>, %7, %cst_3 [1] : vector<256x128xf32> to vector<256xf32>
    %9 = vector.shape_cast %8 : vector<256xf32> to vector<256x1xf32>
    %cst_4 = arith.constant 7.812500e-03 : f32
    %10 = vector.broadcast %cst_4 : f32 to vector<256x1xf32>
    %11 = arith.mulf %6, %10 : vector<256x1xf32>
    %cst_5 = arith.constant 7.812500e-03 : f32
    %12 = vector.broadcast %cst_5 : f32 to vector<256x1xf32>
    %13 = arith.mulf %9, %12 : vector<256x1xf32>
    %14 = arith.mulf %11, %11 : vector<256x1xf32>
    %15 = arith.subf %13, %14 : vector<256x1xf32>
    %cst_6 = arith.constant 9.99999974E-6 : f32
    %16 = vector.broadcast %cst_6 : f32 to vector<256x1xf32>
    %17 = arith.addf %15, %16 : vector<256x1xf32>
    %18 = math.rsqrt %17 : vector<256x1xf32>
    %cst_7 = arith.constant 0.000000e+00 : f32
    %19 = vector.broadcast %cst_7 : f32 to vector<256x1xf32>
    %20 = arith.subf %19, %11 : vector<256x1xf32>
    %21 = arith.mulf %20, %18 : vector<256x1xf32>
    %c0_8 = arith.constant 0 : index
    %c0_9 = arith.constant 0 : index
    %22 = vector.load %arg4[%c0_8, %c0_9] : memref<1x128xf32, #tpu.memory_space<vmem>>, vector<1x128xf32>
    %c0_10 = arith.constant 0 : index
    %c0_11 = arith.constant 0 : index
    %23 = vector.load %arg5[%c0_10, %c0_11] : memref<1x128xf32, #tpu.memory_space<vmem>>, vector<1x128xf32>
    %24 = vector.broadcast %18 : vector<256x1xf32> to vector<256x128xf32>
    %25 = arith.mulf %4, %24 : vector<256x128xf32>
    %26 = vector.broadcast %21 : vector<256x1xf32> to vector<256x128xf32>
    %27 = arith.addf %25, %26 : vector<256x128xf32>
    %28 = vector.broadcast %22 : vector<1x128xf32> to vector<256x128xf32>
    %29 = arith.mulf %27, %28 : vector<256x128xf32>
    %30 = vector.broadcast %23 : vector<1x128xf32> to vector<256x128xf32>
    %31 = arith.addf %29, %30 : vector<256x128xf32>
    %c0_12 = arith.constant 0 : index
    %c0_13 = arith.constant 0 : index
    %32 = vector.load %arg3[%c0_12, %c0_13] : memref<8x128xf32, #tpu.memory_space<vmem>>, vector<8x128xf32>
    %cst_14 = arith.constant dense<0.000000e+00> : vector<8x256xf32>
    %33 = tpu.matmul %32, %31, %cst_14 {dimension_numbers = #tpu.dot_dimension_numbers<[1], [1], [0], [0], [0, 0, 1, 0], [], []>} : vector<8x128xf32>, vector<256x128xf32>, vector<8x256xf32> -> vector<8x256xf32>
    %cst_15 = arith.constant 0.0883883461 : f32
    %34 = vector.broadcast %cst_15 : f32 to vector<8x256xf32>
    %35 = arith.mulf %33, %34 : vector<8x256xf32>
    %36 = vector.extract_strided_slice %35 {offsets = [0, 0], sizes = [8, 128], strides = [1, 1]} : vector<8x256xf32> to vector<8x128xf32>
    %37 = vector.extract_strided_slice %31 {offsets = [0, 0], sizes = [128, 128], strides = [1, 1]} : vector<256x128xf32> to vector<128x128xf32>
    %c0_16 = arith.constant 0 : index
    %c0_17 = arith.constant 0 : index
    %c0_18 = arith.constant 0 : index
    %38 = vector.load %arg7[%c0_16, %c0_17, %c0_18] : memref<2x8x1xf32, #tpu.memory_space<vmem>>, vector<1x8x1xf32>
    %39 = vector.shape_cast %38 : vector<1x8x1xf32> to vector<8x1xf32>
    %cst_19 = arith.constant dense<0xFF800000> : vector<8xf32>
    %40 = vector.multi_reduction <maximumf>, %36, %cst_19 [1] : vector<8x128xf32> to vector<8xf32>
    %41 = vector.shape_cast %40 : vector<8xf32> to vector<8x1xf32>
    %42 = arith.maximumf %39, %41 : vector<8x1xf32>
    %43 = arith.subf %39, %42 : vector<8x1xf32>
    %44 = math.exp %43 : vector<8x1xf32>
    %45 = vector.broadcast %42 : vector<8x1xf32> to vector<8x128xf32>
    %46 = arith.subf %36, %45 : vector<8x128xf32>
    %47 = math.exp %46 : vector<8x128xf32>
    %c0_20 = arith.constant 0 : index
    %c0_21 = arith.constant 0 : index
    %c0_22 = arith.constant 0 : index
    %48 = vector.load %arg8[%c0_20, %c0_21, %c0_22] : memref<2x8x1xf32, #tpu.memory_space<vmem>>, vector<1x8x1xf32>
    %49 = vector.shape_cast %48 : vector<1x8x1xf32> to vector<8x1xf32>
    %50 = arith.mulf %44, %49 : vector<8x1xf32>
    %cst_23 = arith.constant dense<0.000000e+00> : vector<8xf32>
    %51 = vector.multi_reduction <add>, %47, %cst_23 [1] : vector<8x128xf32> to vector<8xf32>
    %52 = vector.shape_cast %51 : vector<8xf32> to vector<8x1xf32>
    %53 = arith.addf %50, %52 : vector<8x1xf32>
    %c0_24 = arith.constant 0 : index
    %c0_25 = arith.constant 0 : index
    %c0_26 = arith.constant 0 : index
    %54 = vector.load %arg8[%c0_24, %c0_25, %c0_26] : memref<2x8x1xf32, #tpu.memory_space<vmem>>, vector<1x8x1xf32>
    %55 = vector.shape_cast %54 : vector<1x8x1xf32> to vector<8x1xf32>
    %56 = vector.shape_cast %53 : vector<8x1xf32> to vector<1x8x1xf32>
    tpu.vector_store %arg8[%c0_24, %c0_25, %c0_26], %56 {strides = array<i32>} : memref<2x8x1xf32, #tpu.memory_space<vmem>>, vector<1x8x1xf32>,
    %c0_27 = arith.constant 0 : index
    %c0_28 = arith.constant 0 : index
    %c0_29 = arith.constant 0 : index
    %57 = vector.load %arg9[%c0_27, %c0_28, %c0_29] : memref<2x8x128xf32, #tpu.memory_space<vmem>>, vector<1x8x128xf32>
    %58 = vector.shape_cast %57 : vector<1x8x128xf32> to vector<8x128xf32>
    %59 = vector.broadcast %44 : vector<8x1xf32> to vector<8x128xf32>
    %60 = arith.mulf %59, %58 : vector<8x128xf32>
    %cst_30 = arith.constant dense<0.000000e+00> : vector<8x128xf32>
    %61 = tpu.matmul %47, %37, %cst_30 {dimension_numbers = #tpu.dot_dimension_numbers<[1], [0], [0], [1], [0, 0, 1, 1], [], []>} : vector<8x128xf32>, vector<128x128xf32>, vector<8x128xf32> -> vector<8x128xf32>
    %62 = arith.addf %60, %61 : vector<8x128xf32>
    %c0_31 = arith.constant 0 : index
    %c0_32 = arith.constant 0 : index
    %c0_33 = arith.constant 0 : index
    %63 = vector.load %arg9[%c0_31, %c0_32, %c0_33] : memref<2x8x128xf32, #tpu.memory_space<vmem>>, vector<1x8x128xf32>
    %64 = vector.shape_cast %63 : vector<1x8x128xf32> to vector<8x128xf32>
    %65 = vector.shape_cast %62 : vector<8x128xf32> to vector<1x8x128xf32>
    tpu.vector_store %arg9[%c0_31, %c0_32, %c0_33], %65 {strides = array<i32>} : memref<2x8x128xf32, #tpu.memory_space<vmem>>, vector<1x8x128xf32>,
    %c0_34 = arith.constant 0 : index
    %c0_35 = arith.constant 0 : index
    %c0_36 = arith.constant 0 : index
    %66 = vector.load %arg7[%c0_34, %c0_35, %c0_36] : memref<2x8x1xf32, #tpu.memory_space<vmem>>, vector<1x8x1xf32>
    %67 = vector.shape_cast %66 : vector<1x8x1xf32> to vector<8x1xf32>
    %68 = vector.shape_cast %42 : vector<8x1xf32> to vector<1x8x1xf32>
    tpu.vector_store %arg7[%c0_34, %c0_35, %c0_36], %68 {strides = array<i32>} : memref<2x8x1xf32, #tpu.memory_space<vmem>>, vector<1x8x1xf32>,
    %69 = vector.extract_strided_slice %35 {offsets = [0, 128], sizes = [8, 128], strides = [1, 1]} : vector<8x256xf32> to vector<8x128xf32>
    %70 = vector.extract_strided_slice %31 {offsets = [128, 0], sizes = [128, 128], strides = [1, 1]} : vector<256x128xf32> to vector<128x128xf32>
    %c1 = arith.constant 1 : index
    %c0_37 = arith.constant 0 : index
    %c0_38 = arith.constant 0 : index
    %71 = vector.load %arg7[%c1, %c0_37, %c0_38] : memref<2x8x1xf32, #tpu.memory_space<vmem>>, vector<1x8x1xf32>
    %72 = vector.shape_cast %71 : vector<1x8x1xf32> to vector<8x1xf32>
    %cst_39 = arith.constant dense<0xFF800000> : vector<8xf32>
    %73 = vector.multi_reduction <maximumf>, %69, %cst_39 [1] : vector<8x128xf32> to vector<8xf32>
    %74 = vector.shape_cast %73 : vector<8xf32> to vector<8x1xf32>
    %75 = arith.maximumf %72, %74 : vector<8x1xf32>
    %76 = arith.subf %72, %75 : vector<8x1xf32>
    %77 = math.exp %76 : vector<8x1xf32>
    %78 = vector.broadcast %75 : vector<8x1xf32> to vector<8x128xf32>
    %79 = arith.subf %69, %78 : vector<8x128xf32>
    %80 = math.exp %79 : vector<8x128xf32>
    %c1_40 = arith.constant 1 : index
    %c0_41 = arith.constant 0 : index
    %c0_42 = arith.constant 0 : index
    %81 = vector.load %arg8[%c1_40, %c0_41, %c0_42] : memref<2x8x1xf32, #tpu.memory_space<vmem>>, vector<1x8x1xf32>
    %82 = vector.shape_cast %81 : vector<1x8x1xf32> to vector<8x1xf32>
    %83 = arith.mulf %77, %82 : vector<8x1xf32>
    %cst_43 = arith.constant dense<0.000000e+00> : vector<8xf32>
    %84 = vector.multi_reduction <add>, %80, %cst_43 [1] : vector<8x128xf32> to vector<8xf32>
    %85 = vector.shape_cast %84 : vector<8xf32> to vector<8x1xf32>
    %86 = arith.addf %83, %85 : vector<8x1xf32>
    %c1_44 = arith.constant 1 : index
    %c0_45 = arith.constant 0 : index
    %c0_46 = arith.constant 0 : index
    %87 = vector.load %arg8[%c1_44, %c0_45, %c0_46] : memref<2x8x1xf32, #tpu.memory_space<vmem>>, vector<1x8x1xf32>
    %88 = vector.shape_cast %87 : vector<1x8x1xf32> to vector<8x1xf32>
    %89 = vector.shape_cast %86 : vector<8x1xf32> to vector<1x8x1xf32>
    tpu.vector_store %arg8[%c1_44, %c0_45, %c0_46], %89 {strides = array<i32>} : memref<2x8x1xf32, #tpu.memory_space<vmem>>, vector<1x8x1xf32>,
    %c1_47 = arith.constant 1 : index
    %c0_48 = arith.constant 0 : index
    %c0_49 = arith.constant 0 : index
    %90 = vector.load %arg9[%c1_47, %c0_48, %c0_49] : memref<2x8x128xf32, #tpu.memory_space<vmem>>, vector<1x8x128xf32>
    %91 = vector.shape_cast %90 : vector<1x8x128xf32> to vector<8x128xf32>
    %92 = vector.broadcast %77 : vector<8x1xf32> to vector<8x128xf32>
    %93 = arith.mulf %92, %91 : vector<8x128xf32>
    %cst_50 = arith.constant dense<0.000000e+00> : vector<8x128xf32>
    %94 = tpu.matmul %80, %70, %cst_50 {dimension_numbers = #tpu.dot_dimension_numbers<[1], [0], [0], [1], [0, 0, 1, 1], [], []>} : vector<8x128xf32>, vector<128x128xf32>, vector<8x128xf32> -> vector<8x128xf32>
    %95 = arith.addf %93, %94 : vector<8x128xf32>
    %c1_51 = arith.constant 1 : index
    %c0_52 = arith.constant 0 : index
    %c0_53 = arith.constant 0 : index
    %96 = vector.load %arg9[%c1_51, %c0_52, %c0_53] : memref<2x8x128xf32, #tpu.memory_space<vmem>>, vector<1x8x128xf32>
    %97 = vector.shape_cast %96 : vector<1x8x128xf32> to vector<8x128xf32>
    %98 = vector.shape_cast %95 : vector<8x128xf32> to vector<1x8x128xf32>
    tpu.vector_store %arg9[%c1_51, %c0_52, %c0_53], %98 {strides = array<i32>} : memref<2x8x128xf32, #tpu.memory_space<vmem>>, vector<1x8x128xf32>,
    %c1_54 = arith.constant 1 : index
    %c0_55 = arith.constant 0 : index
    %c0_56 = arith.constant 0 : index
    %99 = vector.load %arg7[%c1_54, %c0_55, %c0_56] : memref<2x8x1xf32, #tpu.memory_space<vmem>>, vector<1x8x1xf32>
    %100 = vector.shape_cast %99 : vector<1x8x1xf32> to vector<8x1xf32>
    %101 = vector.shape_cast %75 : vector<8x1xf32> to vector<1x8x1xf32>
    tpu.vector_store %arg7[%c1_54, %c0_55, %c0_56], %101 {strides = array<i32>} : memref<2x8x1xf32, #tpu.memory_space<vmem>>, vector<1x8x1xf32>,
    %c0_i32_57 = arith.constant 0 : i32
    %102 = arith.cmpi eq, %arg1, %c0_i32_57 : i32
    %103 = arith.extui %102 : i1 to i32
    %c0_i32_58 = arith.constant 0 : i32
    %104 = arith.cmpi ne, %103, %c0_i32_58 : i32
    scf.if %104 {
      %c0_59 = arith.constant 0 : index
      %c0_60 = arith.constant 0 : index
      %c0_61 = arith.constant 0 : index
      %105 = vector.load %arg9[%c0_59, %c0_60, %c0_61] : memref<2x8x128xf32, #tpu.memory_space<vmem>>, vector<2x8x128xf32>
      %c0_62 = arith.constant 0 : index
      %c0_63 = arith.constant 0 : index
      %c0_64 = arith.constant 0 : index
      %106 = vector.load %arg8[%c0_62, %c0_63, %c0_64] : memref<2x8x1xf32, #tpu.memory_space<vmem>>, vector<2x8x1xf32>
      %107 = vector.broadcast %106 : vector<2x8x1xf32> to vector<2x8x128xf32>
      %108 = arith.divf %105, %107 : vector<2x8x128xf32>
      %c0_65 = arith.constant 0 : index
      %c0_66 = arith.constant 0 : index
      %c0_67 = arith.constant 0 : index
      %109 = vector.load %arg6[%c0_65, %c0_66, %c0_67] : memref<2x8x128xf32, #tpu.memory_space<vmem>>, vector<2x8x128xf32>
      tpu.vector_store %arg6[%c0_65, %c0_66, %c0_67], %108 {strides = array<i32>} : memref<2x8x128xf32, #tpu.memory_space<vmem>>, vector<2x8x128xf32>,
    } else {
    }
    return
  }
  func.func @transform_0(%arg0: i32, %arg1: i32) -> (i32, i32, i32) {
    %c0_i32 = arith.constant 0 : i32
    %c0_i32_0 = arith.constant 0 : i32
    return %arg0, %arg1, %c0_i32 : i32, i32, i32
  }
  func.func @transform_1(%arg0: i32, %arg1: i32) -> (i32, i32) {
    %c0_i32 = arith.constant 0 : i32
    %c0_i32_0 = arith.constant 0 : i32
    %c0_i32_1 = arith.constant 0 : i32
    return %c0_i32, %c0_i32_0 : i32, i32
  }
  func.func @transform_2(%arg0: i32, %arg1: i32) -> (i32, i32) {
    %c0_i32 = arith.constant 0 : i32
    %c0_i32_0 = arith.constant 0 : i32
    %c0_i32_1 = arith.constant 0 : i32
    return %c0_i32, %c0_i32_0 : i32, i32
  }
  func.func @transform_3(%arg0: i32, %arg1: i32) -> (i32, i32) {
    %c0_i32 = arith.constant 0 : i32
    %c0_i32_0 = arith.constant 0 : i32
    %c0_i32_1 = arith.constant 0 : i32
    return %c0_i32, %c0_i32_0 : i32, i32
  }
  func.func @transform_4(%arg0: i32, %arg1: i32) -> (i32, i32, i32) {
    %c0_i32 = arith.constant 0 : i32
    %c0_i32_0 = arith.constant 0 : i32
    %c0_i32_1 = arith.constant 0 : i32
    return %arg0, %c0_i32, %c0_i32_0 : i32, i32, i32
  }
}

</mosaic_0001>

<bundles_post_ra>
// kernel: tpu_custom_call.1
= control target key start
LH: loop header
LB: loop body
LE: loop exit
PB: predicated region body
PF: predicated region fallthrough
CT: control target
= control target key end

     0   :  { %s2480_s0 = inlined_call_operand.hbm [shape: f32[4,128,128], index: 0, kind: input, shape index: {}]   ;;  %s2481_s1 = inlined_call_operand.hbm [shape: f32[8,128], index: 1, kind: input, shape index: {}]   ;;  %s2482_s2 = inlined_call_operand.vmem [shape: f32[1,128], index: 2, kind: input, shape index: {}]   ;;  %s2483_s3 = inlined_call_operand.vmem [shape: f32[1,128], index: 3, kind: input, shape index: {}]   ;;  %s2484_s4 = inlined_call_operand.hbm [shape: f32[4,8,128], index: 4, kind: output, shape index: {}]  }
   0x1   :  { %2488 = sst [smem:[#allocation15_spill]] %s2481_s1 }
   0x2   :  { %9 = vsyncpa [#allocation6], 0 }
   0x3   :  { %11 = vsyncpa [#allocation6 + $0x1], 0 }
   0x4   :  { %12 = vsyncpa [#allocation9], 0 }
   0x5   :  { %13 = vsyncpa [#allocation7], 0 }
   0x6   :  { %15 = vsyncpa [#allocation7 + $0x1], 0  ;;  %s1763_s15 = smov 0   ;;  %s1765_s16 = smov 0  }
   0x7   :  { %s1767_s17 = smov 0   ;;  %s1769_s18 = smov 0  }
   0x8   :  { %s1771_s19 = smov 0   ;;  %s1773_s20 = smov 0  }
   0x9 LB: > { %s1261_s21 = sadd.s32 4294967295, %s1725_s20   ;;  %s1262_s22 = sadd.s32 4294967294, %s1725_s20   ;;  %s1725_s20 = sphi %s1773_s20, %s21_s20   ;;  %s1721_s19 = sphi %s1771_s19, %s2508_s19   ;;  %s1717_s18 = sphi %s1769_s18, %s2507_s18   ;;  %s1713_s17 = sphi %s1767_s17, %s2506_s17   ;;  %s1709_s16 = sphi %s1765_s16, %s2505_s16   ;;  %s1705_s15 = sphi %s1763_s15, %s2504_s15  }
   0xa   : > { %s42_s23 = sadd.s32 1, %s1713_s17  ;;  %p49_p0 = scmp.ne.s32.totalorder %s1713_s17, %s1709_s16 }
   0xb   : > { %p50_p1 = scmp.eq.s32.totalorder %s1725_s20, 0  ;;  %p55_p2 = scmp.ne.s32.totalorder %s1709_s16, %s1705_s15 }
   0xc   : > { %p1801_p3 = scmp.eq.s32.totalorder %s1261_s21, 0  ;;  %p142_p4 = scmp.eq.s32.totalorder %s1261_s21, 1 }
   0xd   : > { %p1805_p5 = por %p50_p1, %p49_p0  ;;  %p148_p6 = scmp.eq.s32.totalorder %s1262_s22, 1 }
   0xe   : > { %p1811_p7 = por %p1801_p3, %p55_p2  ;;  %p1815_p8 = por %p142_p4, %p49_p0 }
   0xf   : > { %p1819_p9 = por %p148_p6, %p55_p2  ;;  %p1263_p10 = scmp.ge.s32.totalorder %s1725_s20, 1 }
  0x10   : > { %s2491_s26 = scalar_select %p1811_p7, 1, 0 }
  0x11   : > { %s2492_s27 = scalar_select %p1815_p8, 1, 0 }
  0x12   : > { %s2493_s28 = scalar_select %p1819_p9, 1, 0 }
  0x13   : > { %p155_p11 = scmp.lt.s32.totalorder %s1725_s20, 3  ;;  %s1727_s30 = smov [#allocation8]  }
  0x14   : > { %s168_s5 = sshll.u32 %s1727_s30, 4  ;;  %p1443_p1 = scmp.lt.s32.totalorder %s1725_s20, 2  ;;  %s169_s5 = int_to_ptr.vmem [resolvable:$true] %s168_s5 }
  0x15   : > { %p1826_p13 = pnand %p1263_p10, %p155_p11  ;;  %s33_s8 = sadd.s32 1, %s1721_s19 }
  0x16   : > { %p1835_p4 = pnand %p1443_p1, %p1805_p5  ;;  %p35_p6 = scmp.ge.s32.totalorder %s33_s8, 2 }
  0x17   : > { %p1430_p0 = pneg %p1826_p13  ;;  %s185_s9 = sand.u32 1, %s1713_s17  }
  0x18   : > { %s1598_s10 = scalar_lea.vmem %s169_s5, 128  ;;  %p1606_p8 = scmp.lt.s32.totalorder %s169_s5, %s169_s5 }
  0x19   : > { %p1841_p2 = pnand %p1430_p0, %p1801_p3  ;;  %p1599_p11 = scmp.ne.s32.totalorder %s169_s5, %s1598_s10 }
  0x1a   : > { %p1607_p5 = scmp.lt.s32.totalorder %s1598_s10, %s1598_s10 }
  0x1b   : > { %p1589_p10 = pneg %p1841_p2 }
  0x1c   : > { %p1608_p1 = por %p1607_p5, %p1606_p8 }
  0x1d   : > { %p1601_p12 = pnand %p1599_p11, %p1589_p10 }
  0x1f   : > { %p1602_p9 = pneg %p1601_p12 }
  0x21   : > { %p1609_p7 = pnand %p1608_p1, %p1602_p9 }
  0x23   : > { %1612 = shalt.err (!%p1609_p7)
}
  0x24   : > { %s2497_s1 = sld [smem:[#allocation15_spill]]  ;;  %s2510_s8 = smov (%p35_p6, %s33_s8), 0 }
  0x25   : > { %2498 = sst [smem:[#allocation14_spill]] %s2510_s8  ;;  %s1266_s13 = sshll.u32 %s185_s9, 8 }
  0x26   : > { %s37_s14 = ssub.s32 %s1721_s19, %s2510_s8  ;;  %s1282_s21 = sshll.u32 %s1721_s19, 12 }
  0x27   : > { %p40_p12 = scmp.eq.s32.totalorder %s37_s14, 0  ;;  %s198_s30 = scalar_lea.hbm %s2480_s0, %s1282_s21 }
  0x28   : > { %s189_s7 = scalar_lea.vmem [#allocation5], %s1266_s13  ;;  %s186_s12 = scalar_lea.sflag [#allocation6], %s185_s9 }
  0x29   : > { %s199_s10 = sshll.u32 %s189_s7, 4  ;;  %p1615_p7 = pneg %p1835_p4  ;;  %s200_s10 = int_to_ptr.vmem [resolvable:$true] %s199_s10 }
  0x2a   : > { %1433 = dma.hbm_to_vmem [thread:$0]  (!%p1841_p2), %s2497_s1, 128, %s169_s5, [#allocation9]  }
  0x2b   : > { %s1865_s11 = scalar_select %p40_p12, %s1713_s17, %s42_s23  }
  0x2c   : > { %s1626_s5 = scalar_lea.vmem %s200_s10, 4096  ;;  %s1728_s1 = smov [#allocation5]  }
  0x2d   : > { %p1627_p8 = scmp.ne.s32.totalorder %s200_s10, %s1626_s5  ;;  %s1631_s14 = sshll.u32 %s1728_s1, 4  ;;  %s1632_s14 = int_to_ptr.vmem [resolvable:$false] %s1631_s14 }
  0x2e   : > { %s1633_s8 = scalar_lea.vmem %s1632_s14, 8192  ;;  %p1634_p2 = scmp.lt.s32.totalorder %s200_s10, %s1632_s14 }
  0x2f   : > { %p1629_p9 = pnand %p1627_p8, %p1615_p7  ;;  %p1635_p6 = scmp.lt.s32.totalorder %s1633_s8, %s1626_s5 }
  0x31   : > { %p1630_p0 = pneg %p1629_p9  ;;  %p1636_p10 = por %p1635_p6, %p1634_p2 }
  0x33   : > { %p1637_p11 = pnand %p1636_p10, %p1630_p0 }
  0x35   : > { %1640 = shalt.err (!%p1637_p11)
}
  0x36   : > { %s1729_s13 = smov 128   ;;  %s1730_s23 = smov 8  }
  0x37   : > { %1437 = dma.hbm_to_vmem [thread:$0]  (!%p1835_p4), %s198_s30, 4096, %s200_s10, %s186_s12, %s1729_s13, %s1729_s13, %s1730_s23  }
  0x38   : > { %211 = sbr.rel (%p1826_p13) target bundleno = 1142 (0x476), region = 36  ;;  %s1874_s9 = sand.u32 (!%p1826_p13), 1, %s1709_s16  }
  0x39   : > { %s1271_s1 = sshll.u32 (!%p1826_p13), %s1874_s9, 8  ;;  %s214_s21 = scalar_lea.sflag (!%p1826_p13), [#allocation6], %s1874_s9 }
  0x3a   : > { %s1878_s8 = scalar_lea.vmem (!%p1826_p13), [#allocation5], %s1271_s1  ;;  %p2499_p5 = scmp.ne.s32.totalorder (!%p1826_p13), %s2491_s26, 0 }
  0x3d   : > { %1692 = dma.done.wait (%p2499_p5), %s214_s21, 4096  }
  0x3e   : > { %1694 = vsyncadd (%p2499_p5), %s214_s21, 4294963200 }
  0x3f   : > { %1696 = dma.done.wait (%p1801_p3), [#allocation9], 128  }
  0x40   : > { %1698 = vsyncadd (%p1801_p3), [#allocation9], 4294967168  ;;  %v1889_v0 = vld [vmem:[%s1878_s8 + $0xf8] sm:$0xff]  ;;  %v1892_v1 = vld [vmem:[%s1878_s8 + $0x70] sm:$0xff]  ;;  %v1731_v26 = vmov 0.0   ;;  %vm253_vm0 = vcmask 7168  }
  0x41   : > { %354 = vadd.xlane.f32.xlu0 %v1889_v0  ;;  %320 = vadd.xlane.f32.xlu1 %v1892_v1  ;;  %v387_v2 = vmul.f32 %v1889_v0, %v1889_v0  ;;  %v1899_v3 = vld [vmem:[%s1878_s8 + $0x78] sm:$0xff]  ;;  %v1905_v5 = vld [vmem:[%s1878_s8 + $0xf0] sm:$0xff]  ;;  %v370_v7 = vmul.f32 %v1892_v1, %v1892_v1  ;;  %v1913_v8 = vld [vmem:[%s1878_s8 + $0xe8] sm:$0xff]  ;;  %256 = vst.msk [vmem:[#allocation3] sm:$0xff] %vm253_vm0, %v1731_v26  ;;  %vm1734_vm1 = vmmov 0   ;;  %s1273_s22 = sshll.u32 %s1874_s9, 4 }
  0x42   : > { %v371_v4 = vmul.f32 %v1899_v3, %v1899_v3  ;;  %v386_v6 = vmul.f32 %v1905_v5, %v1905_v5  ;;  %v1916_v9 = vld [vmem:[%s1878_s8 + $0x68] sm:$0xff]  ;;  %v385_v10 = vmul.f32 %v1913_v8, %v1913_v8  ;;  %v1925_v12 = vld [vmem:[%s1878_s8 + $0xe0] sm:$0xff]  ;;  %v1937_v16 = vld [vmem:[%s1878_s8 + $0xd8] sm:$0xff]  ;;  %1352 = vmatprep.subr.mxu1 %v1731_v26  ;;  %257 = vst.msk [vmem:[#allocation3 + $0x8] sm:$0xff] %vm253_vm0, %v1731_v26  ;;  %s1283_s25 = sshll.u32 %s1717_s18, 8  ;;  %s245_s30 = scalar_lea.vmem [#allocation10], %s1273_s22 }
  0x43   : > { %v369_v11 = vmul.f32 %v1916_v9, %v1916_v9  ;;  %v1928_v13 = vld [vmem:[%s1878_s8 + $0x60] sm:$0xff]  ;;  %v384_v14 = vmul.f32 %v1925_v12, %v1925_v12  ;;  %v1940_v17 = vld [vmem:[%s1878_s8 + $0x58] sm:$0xff]  ;;  %v383_v18 = vmul.f32 %v1937_v16, %v1937_v16  ;;  %v1949_v20 = vld [vmem:[%s1878_s8 + $0xd0] sm:$0xff]  ;;  %1384 = vmatprep.mubr.msk.f32.mxu1 %vm1734_vm1, %v1731_v26  ;;  %s1167_s7 = sshll.u32 %s245_s30, 4  ;;  %s2430_s5 = scalar_lea.hbm %s2484_s4, %s1283_s25  ;;  %s2432_s7 = int_to_ptr.vmem [resolvable:$true] %s1167_s7 }
  0x44   : > { %v368_v15 = vmul.f32 %v1928_v13, %v1928_v13  ;;  %v367_v19 = vmul.f32 %v1940_v17, %v1940_v17  ;;  %v1952_v21 = vld [vmem:[%s1878_s8 + $0x50] sm:$0xff]  ;;  %v382_v22 = vmul.f32 %v1949_v20, %v1949_v20  ;;  %v1961_v24 = vld [vmem:[%s1878_s8 + $0xc8] sm:$0xff]  ;;  %v1974_v29 = vld [vmem:[%s1878_s8 + $0xc0] sm:$0xff]  ;;  %s1154_s14 = scalar_lea.sflag [#allocation7], %s1874_s9  ;;  %s1641_s13 = scalar_lea.vmem %s2432_s7, 256 }
  0x45   : > { %322 = vadd.xlane.f32.xlu0 %v1899_v3  ;;  %450 = vadd.xlane.f32.xlu1 %v387_v2  ;;  %v366_v23 = vmul.f32 %v1952_v21, %v1952_v21  ;;  %v1964_v25 = vld [vmem:[%s1878_s8 + $0x48] sm:$0xff]  ;;  %v381_v27 = vmul.f32 %v1961_v24, %v1961_v24  ;;  %v1977_v30 = vld [vmem:[%s1878_s8 + $0x40] sm:$0xff]  ;;  %v380_v31 = vmul.f32 %v1974_v29, %v1974_v29  ;;  %v1986_v33 = vld [vmem:[%s1878_s8 + $0xb8] sm:$0xff]  ;;  %p1642_p3 = scmp.ne.s32.totalorder %s2432_s7, %s1641_s13  ;;  %p2500_p13 = scmp.ne.s32.totalorder %s2492_s27, 0 }
  0x46   : > { %v365_v28 = vmul.f32 %v1964_v25, %v1964_v25  ;;  %v364_v32 = vmul.f32 %v1977_v30, %v1977_v30  ;;  %v1989_v34 = vld [vmem:[%s1878_s8 + $0x38] sm:$0xff]  ;;  %v379_v35 = vmul.f32 %v1986_v33, %v1986_v33  ;;  %v1998_v37 = vld [vmem:[%s1878_s8 + $0xb0] sm:$0xff]  ;;  %v2010_v41 = vld [vmem:[%s1878_s8 + $0xa8] sm:$0xff]  ;;  %s1735_s18 = smov [#allocation10]  }
  0x47   : > { %v363_v36 = vmul.f32 %v1989_v34, %v1989_v34  ;;  %v2001_v38 = vld [vmem:[%s1878_s8 + $0x30] sm:$0xff]  ;;  %v378_v39 = vmul.f32 %v1998_v37, %v1998_v37  ;;  %v2013_v42 = vld [vmem:[%s1878_s8 + $0x28] sm:$0xff]  ;;  %v377_v43 = vmul.f32 %v2010_v41, %v2010_v41  ;;  %v2022_v45 = vld [vmem:[%s1878_s8 + $0xa0] sm:$0xff]  ;;  %p1643_p4 = pnand %p1642_p3, %p2500_p13  ;;  %s1645_s23 = sshll.u32 %s1735_s18, 4  ;;  %s1646_s23 = int_to_ptr.vmem [resolvable:$false] %s1645_s23 }
  0x48   : > { %v362_v40 = vmul.f32 %v2001_v38, %v2001_v38  ;;  %v361_v44 = vmul.f32 %v2013_v42, %v2013_v42  ;;  %v2025_v46 = vld [vmem:[%s1878_s8 + $0x20] sm:$0xff]  ;;  %v376_v47 = vmul.f32 %v2022_v45, %v2022_v45  ;;  %v2034_v49 = vld [vmem:[%s1878_s8 + $0x98] sm:$0xff]  ;;  %v278_v53 = vld [vmem:[%s1878_s8 + $0x90] sm:$0xff]  ;;  %s1647_s1 = scalar_lea.vmem %s1646_s23, 512  ;;  %p1648_p12 = scmp.lt.s32.totalorder %s2432_s7, %s1646_s23 }
  0x49   : > { %352 = vadd.xlane.f32.xlu0 %v1905_v5  ;;  %418 = vadd.xlane.f32.xlu1 %v371_v4  ;;  %v360_v48 = vmul.f32 %v2025_v46, %v2025_v46  ;;  %v2037_v50 = vld [vmem:[%s1878_s8 + $0x18] sm:$0xff]  ;;  %v375_v51 = vmul.f32 %v2034_v49, %v2034_v49  ;;  %v262_v54 = vld [vmem:[%s1878_s8 + $0x10] sm:$0xff]  ;;  %v374_v55 = vmul.f32 %v278_v53, %v278_v53  ;;  %v277_v57 = vld [vmem:[%s1878_s8 + $0x88] sm:$0xff]  ;;  %p1644_p1 = pneg %p1643_p4  ;;  %p1649_p7 = scmp.lt.s32.totalorder %s1647_s1, %s1641_s13 }
  0x4a   : > { %v359_v52 = vmul.f32 %v2037_v50, %v2037_v50  ;;  %v358_v56 = vmul.f32 %v262_v54, %v262_v54  ;;  %v261_v58 = vld [vmem:[%s1878_s8 + $0x8] sm:$0xff]  ;;  %v373_v59 = vmul.f32 %v277_v57, %v277_v57  ;;  %v276_v61 = vld [vmem:[%s1878_s8 + $0x80] sm:$0xff] }
  0x4b   : > { %v357_v60 = vmul.f32 %v261_v58, %v261_v58  ;;  %v260_v62 = vld [vmem:[%s1878_s8] sm:$0xff]  ;;  %v372_v63 = vmul.f32 %v276_v61, %v276_v61  ;;  %p1650_p8 = por %p1649_p7, %p1648_p12 }
  0x4c   : > { %v356_v2 = vmul.f32 %v260_v62, %v260_v62 }
  0x4d   : > { %448 = vadd.xlane.f32.xlu0 %v386_v6  ;;  %416 = vadd.xlane.f32.xlu1 %v370_v7  ;;  %p1651_p9 = pnand %p1650_p8, %p1644_p1 }
  0x51   : > { %350 = vadd.xlane.f32.xlu0 %v1913_v8  ;;  %318 = vadd.xlane.f32.xlu1 %v1916_v9 }
  0x55   : > { %446 = vadd.xlane.f32.xlu0 %v385_v10  ;;  %414 = vadd.xlane.f32.xlu1 %v369_v11 }
  0x59   : > { %348 = vadd.xlane.f32.xlu0 %v1925_v12  ;;  %316 = vadd.xlane.f32.xlu1 %v1928_v13 }
  0x5d   : > { %444 = vadd.xlane.f32.xlu0 %v384_v14  ;;  %412 = vadd.xlane.f32.xlu1 %v368_v15 }
  0x61   : > { %346 = vadd.xlane.f32.xlu0 %v1937_v16  ;;  %314 = vadd.xlane.f32.xlu1 %v1940_v17 }
  0x65   : > { %442 = vadd.xlane.f32.xlu0 %v383_v18  ;;  %410 = vadd.xlane.f32.xlu1 %v367_v19 }
  0x69   : > { %344 = vadd.xlane.f32.xlu0 %v1949_v20  ;;  %312 = vadd.xlane.f32.xlu1 %v1952_v21 }
  0x6d   : > { %440 = vadd.xlane.f32.xlu0 %v382_v22  ;;  %408 = vadd.xlane.f32.xlu1 %v366_v23 }
  0x71   : > { %342 = vadd.xlane.f32.xlu0 %v1961_v24  ;;  %310 = vadd.xlane.f32.xlu1 %v1964_v25 }
  0x75   : > { %438 = vadd.xlane.f32.xlu0 %v381_v27  ;;  %406 = vadd.xlane.f32.xlu1 %v365_v28 }
  0x79   : > { %340 = vadd.xlane.f32.xlu0 %v1974_v29  ;;  %308 = vadd.xlane.f32.xlu1 %v1977_v30 }
  0x7d   : > { %436 = vadd.xlane.f32.xlu0 %v380_v31  ;;  %404 = vadd.xlane.f32.xlu1 %v364_v32 }
  0x81   : > { %338 = vadd.xlane.f32.xlu0 %v1986_v33  ;;  %306 = vadd.xlane.f32.xlu1 %v1989_v34 }
  0x85   : > { %434 = vadd.xlane.f32.xlu0 %v379_v35  ;;  %402 = vadd.xlane.f32.xlu1 %v363_v36 }
  0x89   : > { %336 = vadd.xlane.f32.xlu0 %v1998_v37  ;;  %304 = vadd.xlane.f32.xlu1 %v2001_v38 }
  0x8d   : > { %432 = vadd.xlane.f32.xlu0 %v378_v39  ;;  %400 = vadd.xlane.f32.xlu1 %v362_v40 }
  0x91   : > { %334 = vadd.xlane.f32.xlu0 %v2010_v41  ;;  %302 = vadd.xlane.f32.xlu1 %v2013_v42 }
  0x95   : > { %430 = vadd.xlane.f32.xlu0 %v377_v43  ;;  %398 = vadd.xlane.f32.xlu1 %v361_v44 }
  0x99   : > { %332 = vadd.xlane.f32.xlu0 %v2022_v45  ;;  %300 = vadd.xlane.f32.xlu1 %v2025_v46 }
  0x9d   : > { %428 = vadd.xlane.f32.xlu0 %v376_v47  ;;  %396 = vadd.xlane.f32.xlu1 %v360_v48 }
  0xa1   : > { %330 = vadd.xlane.f32.xlu0 %v2034_v49  ;;  %298 = vadd.xlane.f32.xlu1 %v2037_v50 }
  0xa5   : > { %426 = vadd.xlane.f32.xlu0 %v375_v51  ;;  %394 = vadd.xlane.f32.xlu1 %v359_v52 }
  0xa9   : > { %328 = vadd.xlane.f32.xlu0 %v278_v53  ;;  %296 = vadd.xlane.f32.xlu1 %v262_v54 }
  0xad   : > { %424 = vadd.xlane.f32.xlu0 %v374_v55  ;;  %392 = vadd.xlane.f32.xlu1 %v358_v56 }
  0xb1   : > { %326 = vadd.xlane.f32.xlu0 %v277_v57  ;;  %294 = vadd.xlane.f32.xlu1 %v261_v58 }
  0xb5   : > { %422 = vadd.xlane.f32.xlu0 %v373_v59  ;;  %390 = vadd.xlane.f32.xlu1 %v357_v60 }
  0xb9   : > { %324 = vadd.xlane.f32.xlu0 %v276_v61  ;;  %292 = vadd.xlane.f32.xlu1 %v260_v62 }
  0xbd   : > { %420 = vadd.xlane.f32.xlu0 %v372_v63  ;;  %388 = vadd.xlane.f32.xlu1 %v356_v2 }
  0xca   : > { %v355_v4 = vpop.xlane.xlu0 %354  ;;  %v321_v6 = vpop.xlane.xlu1 %320 }
  0xcb   : > { %v483_v7 = vmul.f32 0.0078125, %v355_v4  ;;  %v2053_v22 = vmul.f32 0.0078125, %v321_v6 }
  0xcd   : > { %v547_v14 = vmul.f32 %v483_v7, %v483_v7  ;;  %v530_v39 = vmul.f32 %v2053_v22, %v2053_v22 }
  0xce   : > { %v323_v10 = vpop.xlane.xlu0 %322  ;;  %v451_v11 = vpop.xlane.xlu1 %450 }
  0xcf   : > { %v2051_v15 = vmul.f32 0.0078125, %v323_v10  ;;  %v515_v18 = vmul.f32 0.0078125, %v451_v11 }
  0xd1   : > { %v579_v19 = vsub.f32 %v515_v18, %v547_v14  ;;  %v531_v28 = vmul.f32 %v2051_v15, %v2051_v15  ;;  %v675_v14 = vsub.f32 0.0, %v483_v7  ;;  %v2084_v7 = vld [vmem:[%s2482_s2] ss:$0 sm:$0xff] }
  0xd2   : > { %v353_v23 = vpop.xlane.xlu0 %352  ;;  %v419_v27 = vpop.xlane.xlu1 %418 }
  0xd3   : > { %v611_v31 = vadd.f32 1e-05, %v579_v19  ;;  %v2057_v32 = vmul.f32 0.0078125, %v353_v23  ;;  %v499_v35 = vmul.f32 0.0078125, %v419_v27 }
  0xd5   : > { %1505 = vrsqrt.f32 %v611_v31  ;;  %v563_v36 = vsub.f32 %v499_v35, %v531_v28  ;;  %v546_v44 = vmul.f32 %v2057_v32, %v2057_v32 }
  0xd6   : > { %v449_v40 = vpop.xlane.xlu0 %448  ;;  %v417_v43 = vpop.xlane.xlu1 %416 }
  0xd7   : > { %v595_v47 = vadd.f32 1e-05, %v563_v36  ;;  %v514_v48 = vmul.f32 0.0078125, %v449_v40  ;;  %v498_v51 = vmul.f32 0.0078125, %v417_v43  ;;  %v659_v40 = vsub.f32 0.0, %v2051_v15 }
  0xd9   : > { %1507 = vrsqrt.f32 %v595_v47  ;;  %v578_v52 = vsub.f32 %v514_v48, %v546_v44  ;;  %v562_v53 = vsub.f32 %v498_v51, %v530_v39  ;;  %v2076_v39 = vld [vmem:[#allocation8] sm:$0xff] }
  0xda   : > { %v351_v54 = vpop.xlane.xlu0 %350  ;;  %v319_v55 = vpop.xlane.xlu1 %318  ;;  %1316 = vmatprep.mubr.f32.mxu0 %v2076_v39 }
  0xdb   : > { %v610_v56 = vadd.f32 1e-05, %v578_v52  ;;  %v594_v57 = vadd.f32 1e-05, %v562_v53  ;;  %v2063_v58 = vmul.f32 0.0078125, %v351_v54  ;;  %v2065_v59 = vmul.f32 0.0078125, %v319_v55 }
  0xdc   : > { %v2092_v53 = vld [vmem:[%s2483_s3] ss:$0 sm:$0xff] }
  0xdd   : > { %1509 = vrsqrt.f32 %v610_v56  ;;  %v529_v60 = vmul.f32 %v2065_v59, %v2065_v59  ;;  %v545_v63 = vmul.f32 %v2063_v58, %v2063_v58 }
  0xde   : > { %1511 = vrsqrt.f32 %v594_v57  ;;  %v447_v61 = vpop.xlane.xlu0 %446  ;;  %v415_v62 = vpop.xlane.xlu1 %414 }
  0xdf   : > { %v513_v2 = vmul.f32 0.0078125, %v447_v61  ;;  %v497_v4 = vmul.f32 0.0078125, %v415_v62 }
  0xe1   : > { %v577_v6 = vsub.f32 %v513_v2, %v545_v63  ;;  %v561_v10 = vsub.f32 %v497_v4, %v529_v60  ;;  %v658_v63 = vsub.f32 0.0, %v2053_v22  ;;  %v674_v2 = vsub.f32 0.0, %v2057_v32 }
  0xe2   : > { %v1506_v11 = vpop.eup %1505  ;;  %v349_v18 = vpop.xlane.xlu0 %348 }
  0xe3   : > { %v317_v19 = vpop.xlane.xlu1 %316  ;;  %v609_v23 = vadd.f32 1e-05, %v577_v6  ;;  %v593_v27 = vadd.f32 1e-05, %v561_v10  ;;  %v2071_v28 = vmul.f32 0.0078125, %v349_v18  ;;  %v707_v35 = vmul.f32 %v1506_v11, %v675_v14 }
  0xe4   : > { %v2073_v31 = vmul.f32 0.0078125, %v317_v19  ;;  %v741_v36 = vmul.f32 %v1506_v11, %v1889_v0 }
  0xe5   : > { %1513 = vrsqrt.f32 %v609_v23  ;;  %v544_v0 = vmul.f32 %v2071_v28, %v2071_v28 }
  0xe6   : > { %v528_v43 = vmul.f32 %v2073_v31, %v2073_v31  ;;  %v1508_v44 = vpop.eup %1507  ;;  %1515 = vrsqrt.f32 %v593_v27  ;;  %v445_v47 = vpop.xlane.xlu0 %444  ;;  %v773_v51 = vadd.f32 %v741_v36, %v707_v35 }
  0xe7   : > { %v413_v48 = vpop.xlane.xlu1 %412  ;;  %v512_v15 = vmul.f32 0.0078125, %v445_v47  ;;  %v691_v54 = vmul.f32 %v1508_v44, %v659_v40  ;;  %v725_v55 = vmul.f32 %v1508_v44, %v1899_v3 }
  0xe8   : > { %v496_v52 = vmul.f32 0.0078125, %v413_v48  ;;  %v811_v56 = vmul.f32 %v2084_v7, %v773_v51 }
  0xe9   : > { %v576_v57 = vsub.f32 %v512_v15, %v544_v0  ;;  %v757_v61 = vadd.f32 %v725_v55, %v691_v54 }
  0xea   : > { %v560_v60 = vsub.f32 %v496_v52, %v528_v43  ;;  %v1510_v62 = vpop.eup %1509  ;;  %v347_v4 = vpop.xlane.xlu0 %346  ;;  %v2099_v10 = vadd.f32 %v2092_v53, %v811_v56  ;;  %v673_v56 = vsub.f32 0.0, %v2063_v58 }
  0xeb   : > { %v315_v6 = vpop.xlane.xlu1 %314  ;;  %v1512_v11 = vpop.eup %1511  ;;  %v608_v14 = vadd.f32 1e-05, %v576_v57  ;;  %v2101_v19 = vmul.f32 0.0078125, %v347_v4  ;;  %v795_v23 = vmul.f32 %v2084_v7, %v757_v61  ;;  %v706_v27 = vmul.f32 %v1510_v62, %v674_v2 }
  0xec   : > { %v592_v18 = vadd.f32 1e-05, %v560_v60  ;;  %v2103_v3 = vmul.f32 0.0078125, %v315_v6  ;;  %1284 = vmatprep.subr.mxu0 %v2099_v10  ;;  %v740_v22 = vmul.f32 %v1510_v62, %v1905_v5  ;;  %v690_v35 = vmul.f32 %v1512_v11, %v658_v63 }
  0xed   : > { %1517 = vrsqrt.f32 %v608_v14  ;;  %v833_v43 = vadd.f32 %v2092_v53, %v795_v23  ;;  %v543_v0 = vmul.f32 %v2101_v19, %v2101_v19  ;;  %v724_v51 = vmul.f32 %v1512_v11, %v1892_v1 }
  0xee   : > { %v527_v32 = vmul.f32 %v2103_v3, %v2103_v3  ;;  %1519 = vrsqrt.f32 %v592_v18  ;;  %v443_v36 = vpop.xlane.xlu0 %442  ;;  %v772_v44 = vadd.f32 %v740_v22, %v706_v27  ;;  %v657_v57 = vsub.f32 0.0, %v2065_v59 }
  0xef   : > { %v411_v40 = vpop.xlane.xlu1 %410  ;;  %v511_v47 = vmul.f32 0.0078125, %v443_v36  ;;  %1285 = vmatpush3.xpose.msra.mxu0 %v833_v43  ;;  %1353 = vmatpush3.msra.mxu1 %v833_v43  ;;  %v756_v54 = vadd.f32 %v724_v51, %v690_v35  ;;  %v672_v51 = vsub.f32 0.0, %v2071_v28 }
  0xf0   : > { %v495_v48 = vmul.f32 0.0078125, %v411_v40  ;;  %v810_v5 = vmul.f32 %v2084_v7, %v772_v44  ;;  %1354 = vmatprep.subr.mxu1 %v1731_v26 }
  0xf1   : > { %v575_v15 = vsub.f32 %v511_v47, %v543_v0  ;;  %v794_v11 = vmul.f32 %v2084_v7, %v756_v54 }
  0xf2   : > { %v559_v52 = vsub.f32 %v495_v48, %v527_v32  ;;  %v1514_v55 = vpop.eup %1513  ;;  %v345_v60 = vpop.xlane.xlu0 %344  ;;  %v2119_v62 = vadd.f32 %v2092_v53, %v810_v5  ;;  %v656_v5 = vsub.f32 0.0, %v2073_v31 }
  0xf3   : > { %v313_v61 = vpop.xlane.xlu1 %312  ;;  %v1516_v1 = vpop.eup %1515  ;;  %v607_v63 = vadd.f32 1e-05, %v575_v15  ;;  %v2121_v4 = vmul.f32 0.0078125, %v345_v60  ;;  %v705_v14 = vmul.f32 %v1514_v55, %v673_v56  ;;  %v739_v58 = vmul.f32 %v1514_v55, %v1913_v8 }
  0xf4   : > { %v591_v2 = vadd.f32 1e-05, %v559_v52  ;;  %v2123_v6 = vmul.f32 0.0078125, %v313_v61  ;;  %1286 = vmatprep.subr.mxu0 %v2119_v62  ;;  %v689_v18 = vmul.f32 %v1516_v1, %v657_v57  ;;  %v832_v23 = vadd.f32 %v2092_v53, %v794_v11 }
  0xf5   : > { %1521 = vrsqrt.f32 %v607_v63  ;;  %v771_v32 = vadd.f32 %v739_v58, %v705_v14  ;;  %v542_v35 = vmul.f32 %v2121_v4, %v2121_v4  ;;  %v723_v43 = vmul.f32 %v1516_v1, %v1916_v9 }
  0xf6   : > { %v526_v59 = vmul.f32 %v2123_v6, %v2123_v6  ;;  %1523 = vrsqrt.f32 %v591_v2  ;;  %v441_v27 = vpop.xlane.xlu0 %440  ;;  %1355 = vmatpush3.msra.mxu1 %v832_v23  ;;  %1287 = vmatpush3.xpose.msra.mxu0 %v832_v23 }
  0xf7   : > { %v409_v22 = vpop.xlane.xlu1 %408  ;;  %v510_v36 = vmul.f32 0.0078125, %v441_v27  ;;  %v809_v8 = vmul.f32 %v2084_v7, %v771_v32  ;;  %1356 = vmatprep.subr.mxu1 %v1731_v26  ;;  %v755_v47 = vadd.f32 %v723_v43, %v689_v18  ;;  %v655_v43 = vsub.f32 0.0, %v2103_v3 }
  0xf8   : > { %v494_v40 = vmul.f32 0.0078125, %v409_v22 }
  0xf9   : > { %v574_v44 = vsub.f32 %v510_v36, %v542_v35  ;;  %v2139_v54 = vadd.f32 %v2092_v53, %v809_v8  ;;  %v793_v61 = vmul.f32 %v2084_v7, %v755_v47 }
  0xfa   : > { %v558_v0 = vsub.f32 %v494_v40, %v526_v59  ;;  %v1518_v48 = vpop.eup %1517  ;;  %v343_v15 = vpop.xlane.xlu0 %342  ;;  %v671_v40 = vsub.f32 0.0, %v2101_v19 }
  0xfb   : > { %v311_v52 = vpop.xlane.xlu1 %310  ;;  %v1520_v9 = vpop.eup %1519  ;;  %v606_v55 = vadd.f32 1e-05, %v574_v44  ;;  %v2141_v57 = vmul.f32 0.0078125, %v343_v15  ;;  %1288 = vmatprep.subr.mxu0 %v2139_v54  ;;  %v704_v1 = vmul.f32 %v1518_v48, %v672_v51  ;;  %v738_v28 = vmul.f32 %v1518_v48, %v1925_v12 }
  0xfc   : > { %v590_v56 = vadd.f32 1e-05, %v558_v0  ;;  %v2143_v60 = vmul.f32 0.0078125, %v311_v52  ;;  %v688_v63 = vmul.f32 %v1520_v9, %v656_v5  ;;  %v831_v2 = vadd.f32 %v2092_v53, %v793_v61 }
  0xfd   : > { %1525 = vrsqrt.f32 %v606_v55  ;;  %v770_v58 = vadd.f32 %v738_v28, %v704_v1  ;;  %v541_v59 = vmul.f32 %v2141_v57, %v2141_v57  ;;  %v722_v27 = vmul.f32 %v1520_v9, %v1928_v13 }
  0xfe   : > { %v525_v31 = vmul.f32 %v2143_v60, %v2143_v60  ;;  %1527 = vrsqrt.f32 %v590_v56  ;;  %v439_v11 = vpop.xlane.xlu0 %438  ;;  %1357 = vmatpush3.msra.mxu1 %v831_v2  ;;  %1289 = vmatpush3.xpose.msra.mxu0 %v831_v2 }
  0xff   : > { %v407_v14 = vpop.xlane.xlu1 %406  ;;  %v509_v18 = vmul.f32 0.0078125, %v439_v11  ;;  %v808_v12 = vmul.f32 %v2084_v7, %v770_v58  ;;  %1358 = vmatprep.subr.mxu1 %v1731_v26  ;;  %v754_v35 = vadd.f32 %v722_v27, %v688_v63 }
 0x100   : > { %v493_v23 = vmul.f32 0.0078125, %v407_v14 }
 0x101   : > { %v573_v22 = vsub.f32 %v509_v18, %v541_v59  ;;  %v2159_v0 = vadd.f32 %v2092_v53, %v808_v12  ;;  %v792_v15 = vmul.f32 %v2084_v7, %v754_v35  ;;  %v670_v18 = vsub.f32 0.0, %v2121_v4 }
 0x102   : > { %v557_v32 = vsub.f32 %v493_v23, %v525_v31  ;;  %v1522_v36 = vpop.eup %1521  ;;  %v341_v8 = vpop.xlane.xlu0 %340  ;;  %v654_v23 = vsub.f32 0.0, %v2123_v6 }
 0x103   : > { %v309_v44 = vpop.xlane.xlu1 %308  ;;  %v1524_v13 = vpop.eup %1523  ;;  %v605_v47 = vadd.f32 1e-05, %v573_v22  ;;  %v2161_v51 = vmul.f32 0.0078125, %v341_v8  ;;  %1290 = vmatprep.subr.mxu0 %v2159_v0  ;;  %v703_v52 = vmul.f32 %v1522_v36, %v671_v40  ;;  %v737_v19 = vmul.f32 %v1522_v36, %v1937_v16 }
 0x104   : > { %v589_v48 = vadd.f32 1e-05, %v557_v32  ;;  %v2163_v5 = vmul.f32 0.0078125, %v309_v44  ;;  %v687_v9 = vmul.f32 %v1524_v13, %v655_v43  ;;  %v830_v55 = vadd.f32 %v2092_v53, %v792_v15 }
 0x105   : > { %1529 = vrsqrt.f32 %v605_v47  ;;  %v769_v1 = vadd.f32 %v737_v19, %v703_v52  ;;  %v540_v28 = vmul.f32 %v2161_v51, %v2161_v51  ;;  %v721_v2 = vmul.f32 %v1524_v13, %v1940_v17 }
 0x106   : > { %v524_v3 = vmul.f32 %v2163_v5, %v2163_v5  ;;  %1531 = vrsqrt.f32 %v589_v48  ;;  %v437_v56 = vpop.xlane.xlu0 %436  ;;  %1359 = vmatpush3.msra.mxu1 %v830_v55  ;;  %1291 = vmatpush3.xpose.msra.mxu0 %v830_v55 }
 0x107   : > { %v405_v61 = vpop.xlane.xlu1 %404  ;;  %v508_v31 = vmul.f32 0.0078125, %v437_v56  ;;  %v807_v16 = vmul.f32 %v2084_v7, %v769_v1  ;;  %1360 = vmatprep.subr.mxu1 %v1731_v26  ;;  %v753_v58 = vadd.f32 %v721_v2, %v687_v9 }
 0x108   : > { %v492_v63 = vmul.f32 0.0078125, %v405_v61 }
 0x109   : > { %v572_v11 = vsub.f32 %v508_v31, %v540_v28  ;;  %v2179_v22 = vadd.f32 %v2092_v53, %v807_v16  ;;  %v791_v43 = vmul.f32 %v2084_v7, %v753_v58  ;;  %v669_v28 = vsub.f32 0.0, %v2141_v57 }
 0x10a   : > { %v556_v14 = vsub.f32 %v492_v63, %v524_v3  ;;  %v1526_v59 = vpop.eup %1525  ;;  %v339_v27 = vpop.xlane.xlu0 %338  ;;  %v653_v31 = vsub.f32 0.0, %v2143_v60 }
 0x10b   : > { %v307_v12 = vpop.xlane.xlu1 %306  ;;  %v1528_v17 = vpop.eup %1527  ;;  %v604_v32 = vadd.f32 1e-05, %v572_v11  ;;  %v2181_v36 = vmul.f32 0.0078125, %v339_v27  ;;  %1292 = vmatprep.subr.mxu0 %v2179_v22  ;;  %v702_v8 = vmul.f32 %v1526_v59, %v670_v18  ;;  %v736_v4 = vmul.f32 %v1526_v59, %v1949_v20 }
 0x10c   : > { %v588_v35 = vadd.f32 1e-05, %v556_v14  ;;  %v2183_v40 = vmul.f32 0.0078125, %v307_v12  ;;  %v686_v44 = vmul.f32 %v1528_v17, %v654_v23  ;;  %v829_v13 = vadd.f32 %v2092_v53, %v791_v43 }
 0x10d   : > { %1533 = vrsqrt.f32 %v604_v32  ;;  %v768_v15 = vadd.f32 %v736_v4, %v702_v8  ;;  %v539_v52 = vmul.f32 %v2181_v36, %v2181_v36  ;;  %v720_v9 = vmul.f32 %v1528_v17, %v1952_v21 }
 0x10e   : > { %v523_v6 = vmul.f32 %v2183_v40, %v2183_v40  ;;  %1535 = vrsqrt.f32 %v588_v35  ;;  %v435_v47 = vpop.xlane.xlu0 %434  ;;  %1361 = vmatpush3.msra.mxu1 %v829_v13  ;;  %1293 = vmatpush3.xpose.msra.mxu0 %v829_v13 }
 0x10f   : > { %v403_v48 = vpop.xlane.xlu1 %402  ;;  %v507_v19 = vmul.f32 0.0078125, %v435_v47  ;;  %v806_v20 = vmul.f32 %v2084_v7, %v768_v15  ;;  %1362 = vmatprep.subr.mxu1 %v1731_v26  ;;  %v752_v61 = vadd.f32 %v720_v9, %v686_v44  ;;  %v668_v15 = vsub.f32 0.0, %v2161_v51 }
 0x110   : > { %v491_v3 = vmul.f32 0.0078125, %v403_v48 }
 0x111   : > { %v571_v55 = vsub.f32 %v507_v19, %v539_v52  ;;  %v2199_v16 = vadd.f32 %v2092_v53, %v806_v20  ;;  %v790_v18 = vmul.f32 %v2084_v7, %v752_v61  ;;  %v652_v52 = vsub.f32 0.0, %v2163_v5 }
 0x112   : > { %v555_v56 = vsub.f32 %v491_v3, %v523_v6  ;;  %v1530_v1 = vpop.eup %1529  ;;  %v337_v63 = vpop.xlane.xlu0 %336 }
 0x113   : > { %v305_v2 = vpop.xlane.xlu1 %304  ;;  %v1532_v21 = vpop.eup %1531  ;;  %v603_v11 = vadd.f32 1e-05, %v571_v55  ;;  %v2201_v58 = vmul.f32 0.0078125, %v337_v63  ;;  %1294 = vmatprep.subr.mxu0 %v2199_v16  ;;  %v701_v23 = vmul.f32 %v1530_v1, %v669_v28  ;;  %v735_v57 = vmul.f32 %v1530_v1, %v1961_v24 }
 0x114   : > { %v587_v14 = vadd.f32 1e-05, %v555_v56  ;;  %v2203_v59 = vmul.f32 0.0078125, %v305_v2  ;;  %v685_v27 = vmul.f32 %v1532_v21, %v653_v31  ;;  %v828_v12 = vadd.f32 %v2092_v53, %v790_v18 }
 0x115   : > { %1537 = vrsqrt.f32 %v603_v11  ;;  %v767_v35 = vadd.f32 %v735_v57, %v701_v23  ;;  %v538_v43 = vmul.f32 %v2201_v58, %v2201_v58  ;;  %v719_v6 = vmul.f32 %v1532_v21, %v1964_v25 }
 0x116   : > { %v522_v60 = vmul.f32 %v2203_v59, %v2203_v59  ;;  %1539 = vrsqrt.f32 %v587_v14  ;;  %v433_v17 = vpop.xlane.xlu0 %432  ;;  %1363 = vmatpush3.msra.mxu1 %v828_v12  ;;  %1295 = vmatpush3.xpose.msra.mxu0 %v828_v12 }
 0x117   : > { %v401_v32 = vpop.xlane.xlu1 %400  ;;  %v506_v8 = vmul.f32 0.0078125, %v433_v17  ;;  %v805_v24 = vmul.f32 %v2084_v7, %v767_v35  ;;  %1364 = vmatprep.subr.mxu1 %v1731_v26  ;;  %v751_v47 = vadd.f32 %v719_v6, %v685_v27  ;;  %v651_v35 = vsub.f32 0.0, %v2183_v40 }
 0x118   : > { %v490_v4 = vmul.f32 0.0078125, %v401_v32  ;;  %v667_v32 = vsub.f32 0.0, %v2181_v36 }
 0x119   : > { %v570_v44 = vsub.f32 %v506_v8, %v538_v43  ;;  %v2219_v9 = vadd.f32 %v2092_v53, %v805_v24  ;;  %v789_v1 = vmul.f32 %v2084_v7, %v751_v47 }
 0x11a   : > { %v554_v13 = vsub.f32 %v490_v4, %v522_v60  ;;  %v1534_v48 = vpop.eup %1533  ;;  %v335_v19 = vpop.xlane.xlu0 %334 }
 0x11b   : > { %v303_v3 = vpop.xlane.xlu1 %302  ;;  %v1536_v25 = vpop.eup %1535  ;;  %v602_v20 = vadd.f32 1e-05, %v570_v44  ;;  %v2221_v56 = vmul.f32 0.0078125, %v335_v19  ;;  %1296 = vmatprep.subr.mxu0 %v2219_v9  ;;  %v700_v28 = vmul.f32 %v1534_v48, %v668_v15  ;;  %v734_v51 = vmul.f32 %v1534_v48, %v1974_v29 }
 0x11c   : > { %v586_v55 = vadd.f32 1e-05, %v554_v13  ;;  %v2223_v61 = vmul.f32 0.0078125, %v303_v3  ;;  %v684_v31 = vmul.f32 %v1536_v25, %v652_v52  ;;  %v827_v63 = vadd.f32 %v2092_v53, %v789_v1 }
 0x11d   : > { %1541 = vrsqrt.f32 %v602_v20  ;;  %v766_v11 = vadd.f32 %v734_v51, %v700_v28  ;;  %v537_v14 = vmul.f32 %v2221_v56, %v2221_v56  ;;  %v718_v57 = vmul.f32 %v1536_v25, %v1977_v30 }
 0x11e   : > { %v521_v5 = vmul.f32 %v2223_v61, %v2223_v61  ;;  %1543 = vrsqrt.f32 %v586_v55  ;;  %v431_v2 = vpop.xlane.xlu0 %430  ;;  %1365 = vmatpush3.msra.mxu1 %v827_v63  ;;  %1297 = vmatpush3.xpose.msra.mxu0 %v827_v63 }
 0x11f   : > { %v399_v21 = vpop.xlane.xlu1 %398  ;;  %v505_v18 = vmul.f32 0.0078125, %v431_v2  ;;  %v804_v29 = vmul.f32 %v2084_v7, %v766_v11  ;;  %1366 = vmatprep.subr.mxu1 %v1731_v26  ;;  %v750_v12 = vadd.f32 %v718_v57, %v684_v31  ;;  %v666_v2 = vsub.f32 0.0, %v2201_v58 }
 0x120   : > { %v489_v23 = vmul.f32 0.0078125, %v399_v21  ;;  %v650_v21 = vsub.f32 0.0, %v2203_v59 }
 0x121   : > { %v569_v60 = vsub.f32 %v505_v18, %v537_v14  ;;  %v2239_v4 = vadd.f32 %v2092_v53, %v804_v29  ;;  %v788_v47 = vmul.f32 %v2084_v7, %v750_v12 }
 0x122   : > { %v553_v27 = vsub.f32 %v489_v23, %v521_v5  ;;  %v1538_v17 = vpop.eup %1537  ;;  %v333_v43 = vpop.xlane.xlu0 %332 }
 0x123   : > { %v301_v8 = vpop.xlane.xlu1 %300  ;;  %v1540_v30 = vpop.eup %1539  ;;  %v601_v6 = vadd.f32 1e-05, %v569_v60  ;;  %v2241_v44 = vmul.f32 0.0078125, %v333_v43  ;;  %1298 = vmatprep.subr.mxu0 %v2239_v4  ;;  %v699_v48 = vmul.f32 %v1538_v17, %v667_v32  ;;  %v733_v36 = vmul.f32 %v1538_v17, %v1986_v33 }
 0x124   : > { %v585_v24 = vadd.f32 1e-05, %v553_v27  ;;  %v2243_v13 = vmul.f32 0.0078125, %v301_v8  ;;  %v683_v15 = vmul.f32 %v1540_v30, %v651_v35  ;;  %v826_v52 = vadd.f32 %v2092_v53, %v788_v47 }
 0x125   : > { %1545 = vrsqrt.f32 %v601_v6  ;;  %v765_v25 = vadd.f32 %v733_v36, %v699_v48  ;;  %v536_v20 = vmul.f32 %v2241_v44, %v2241_v44  ;;  %v717_v28 = vmul.f32 %v1540_v30, %v1989_v34 }
 0x126   : > { %v520_v40 = vmul.f32 %v2243_v13, %v2243_v13  ;;  %1547 = vrsqrt.f32 %v585_v24  ;;  %v429_v19 = vpop.xlane.xlu0 %428  ;;  %1367 = vmatpush3.msra.mxu1 %v826_v52  ;;  %1299 = vmatpush3.xpose.msra.mxu0 %v826_v52  ;;  %v665_v52 = vsub.f32 0.0, %v2221_v56 }
 0x127   : > { %v397_v3 = vpop.xlane.xlu1 %396  ;;  %v504_v55 = vmul.f32 0.0078125, %v429_v19  ;;  %v803_v33 = vmul.f32 %v2084_v7, %v765_v25  ;;  %1368 = vmatprep.subr.mxu1 %v1731_v26  ;;  %v749_v31 = vadd.f32 %v717_v28, %v683_v15  ;;  %v649_v19 = vsub.f32 0.0, %v2223_v61 }
 0x128   : > { %v488_v1 = vmul.f32 0.0078125, %v397_v3 }
 0x129   : > { %v568_v51 = vsub.f32 %v504_v55, %v536_v20  ;;  %v2259_v18 = vadd.f32 %v2092_v53, %v803_v33  ;;  %v787_v27 = vmul.f32 %v2084_v7, %v749_v31 }
 0x12a   : > { %v552_v5 = vsub.f32 %v488_v1, %v520_v40  ;;  %v1542_v63 = vpop.eup %1541  ;;  %v331_v11 = vpop.xlane.xlu0 %330 }
 0x12b   : > { %v299_v14 = vpop.xlane.xlu1 %298  ;;  %v1544_v34 = vpop.eup %1543  ;;  %v600_v23 = vadd.f32 1e-05, %v568_v51  ;;  %v2261_v29 = vmul.f32 0.0078125, %v331_v11  ;;  %1300 = vmatprep.subr.mxu0 %v2259_v18  ;;  %v698_v12 = vmul.f32 %v1542_v63, %v666_v2  ;;  %v732_v58 = vmul.f32 %v1542_v63, %v1998_v37 }
 0x12c   : > { %v584_v57 = vadd.f32 1e-05, %v552_v5  ;;  %v2263_v60 = vmul.f32 0.0078125, %v299_v14  ;;  %v682_v17 = vmul.f32 %v1544_v34, %v650_v21  ;;  %v825_v32 = vadd.f32 %v2092_v53, %v787_v27 }
 0x12d   : > { %1549 = vrsqrt.f32 %v600_v23  ;;  %v764_v8 = vadd.f32 %v732_v58, %v698_v12  ;;  %v535_v30 = vmul.f32 %v2261_v29, %v2261_v29  ;;  %v716_v47 = vmul.f32 %v1544_v34, %v2001_v38 }
 0x12e   : > { %v519_v59 = vmul.f32 %v2263_v60, %v2263_v60  ;;  %1551 = vrsqrt.f32 %v584_v57  ;;  %v427_v35 = vpop.xlane.xlu0 %426  ;;  %1369 = vmatpush3.msra.mxu1 %v825_v32  ;;  %1301 = vmatpush3.xpose.msra.mxu0 %v825_v32  ;;  %v648_v32 = vsub.f32 0.0, %v2243_v13 }
 0x12f   : > { %v395_v43 = vpop.xlane.xlu1 %394  ;;  %v503_v6 = vmul.f32 0.0078125, %v427_v35  ;;  %v802_v37 = vmul.f32 %v2084_v7, %v764_v8  ;;  %1370 = vmatprep.subr.mxu1 %v1731_v26  ;;  %v748_v40 = vadd.f32 %v716_v47, %v682_v17  ;;  %v664_v17 = vsub.f32 0.0, %v2241_v44 }
 0x130   : > { %v487_v24 = vmul.f32 0.0078125, %v395_v43 }
 0x131   : > { %v567_v48 = vsub.f32 %v503_v6, %v535_v30  ;;  %v2279_v20 = vadd.f32 %v2092_v53, %v802_v37  ;;  %v786_v51 = vmul.f32 %v2084_v7, %v748_v40 }
 0x132   : > { %v551_v36 = vsub.f32 %v487_v24, %v519_v59  ;;  %v1546_v15 = vpop.eup %1545  ;;  %v329_v3 = vpop.xlane.xlu0 %328 }
 0x133   : > { %v297_v25 = vpop.xlane.xlu1 %296  ;;  %v1548_v38 = vpop.eup %1547  ;;  %v599_v55 = vadd.f32 1e-05, %v567_v48  ;;  %v2281_v28 = vmul.f32 0.0078125, %v329_v3  ;;  %1302 = vmatprep.subr.mxu0 %v2279_v20  ;;  %v697_v5 = vmul.f32 %v1546_v15, %v665_v52  ;;  %v731_v56 = vmul.f32 %v1546_v15, %v2010_v41 }
 0x134   : > { %v583_v1 = vadd.f32 1e-05, %v551_v36  ;;  %v2283_v33 = vmul.f32 0.0078125, %v297_v25  ;;  %v681_v31 = vmul.f32 %v1548_v38, %v649_v19  ;;  %v824_v63 = vadd.f32 %v2092_v53, %v786_v51 }
 0x135   : > { %1553 = vrsqrt.f32 %v599_v55  ;;  %v763_v11 = vadd.f32 %v731_v56, %v697_v5  ;;  %v534_v14 = vmul.f32 %v2281_v28, %v2281_v28  ;;  %v715_v57 = vmul.f32 %v1548_v38, %v2013_v42 }
 0x136   : > { %v518_v61 = vmul.f32 %v2283_v33, %v2283_v33  ;;  %1555 = vrsqrt.f32 %v583_v1  ;;  %v425_v2 = vpop.xlane.xlu0 %424  ;;  %1371 = vmatpush3.msra.mxu1 %v824_v63  ;;  %1303 = vmatpush3.xpose.msra.mxu0 %v824_v63 }
 0x137   : > { %v393_v21 = vpop.xlane.xlu1 %392  ;;  %v502_v34 = vmul.f32 0.0078125, %v425_v2  ;;  %v801_v41 = vmul.f32 %v2084_v7, %v763_v11  ;;  %1372 = vmatprep.subr.mxu1 %v1731_v26  ;;  %v747_v58 = vadd.f32 %v715_v57, %v681_v31  ;;  %v647_v31 = vsub.f32 0.0, %v2263_v60 }
 0x138   : > { %v486_v23 = vmul.f32 0.0078125, %v393_v21 }
 0x139   : > { %v566_v27 = vsub.f32 %v502_v34, %v534_v14  ;;  %v2299_v8 = vadd.f32 %v2092_v53, %v801_v41  ;;  %v785_v37 = vmul.f32 %v2084_v7, %v747_v58 }
 0x13a   : > { %v550_v12 = vsub.f32 %v486_v23, %v518_v61  ;;  %v1550_v59 = vpop.eup %1549  ;;  %v327_v35 = vpop.xlane.xlu0 %326  ;;  %v663_v61 = vsub.f32 0.0, %v2261_v29 }
 0x13b   : > { %v295_v43 = vpop.xlane.xlu1 %294  ;;  %v1552_v42 = vpop.eup %1551  ;;  %v598_v30 = vadd.f32 1e-05, %v566_v27  ;;  %v2301_v24 = vmul.f32 0.0078125, %v327_v35  ;;  %1304 = vmatprep.subr.mxu0 %v2299_v8  ;;  %v696_v48 = vmul.f32 %v1550_v59, %v664_v17  ;;  %v730_v44 = vmul.f32 %v1550_v59, %v2022_v45 }
 0x13c   : > { %v582_v6 = vadd.f32 1e-05, %v550_v12  ;;  %v2303_v47 = vmul.f32 0.0078125, %v295_v43  ;;  %v680_v36 = vmul.f32 %v1552_v42, %v648_v32  ;;  %v823_v40 = vadd.f32 %v2092_v53, %v785_v37 }
 0x13d   : > { %1557 = vrsqrt.f32 %v598_v30  ;;  %v762_v19 = vadd.f32 %v730_v44, %v696_v48  ;;  %v533_v3 = vmul.f32 %v2301_v24, %v2301_v24  ;;  %v714_v55 = vmul.f32 %v1552_v42, %v2025_v46 }
 0x13e   : > { %v517_v13 = vmul.f32 %v2303_v47, %v2303_v47  ;;  %1559 = vrsqrt.f32 %v582_v6  ;;  %v423_v15 = vpop.xlane.xlu0 %422  ;;  %1373 = vmatpush3.msra.mxu1 %v823_v40  ;;  %1305 = vmatpush3.xpose.msra.mxu0 %v823_v40  ;;  %v662_v30 = vsub.f32 0.0, %v2281_v28  ;;  %v1581_v28 = vld [vmem:[%s1878_s8 + $0x90] sm:$0xff] }
 0x13f   : > { %v391_v52 = vpop.xlane.xlu1 %390  ;;  %v501_v25 = vmul.f32 0.0078125, %v423_v15  ;;  %v800_v45 = vmul.f32 %v2084_v7, %v762_v19  ;;  %1374 = vmatprep.subr.mxu1 %v1731_v26  ;;  %v746_v5 = vadd.f32 %v714_v55, %v680_v36 }
 0x140   : > { %v485_v38 = vmul.f32 0.0078125, %v391_v52 }
 0x141   : > { %v565_v1 = vsub.f32 %v501_v25, %v533_v3  ;;  %v2319_v21 = vadd.f32 %v2092_v53, %v800_v45  ;;  %v784_v57 = vmul.f32 %v2084_v7, %v746_v5 }
 0x142   : > { %v549_v51 = vsub.f32 %v485_v38, %v517_v13  ;;  %v1554_v56 = vpop.eup %1553  ;;  %v325_v63 = vpop.xlane.xlu0 %324  ;;  %v646_v13 = vsub.f32 0.0, %v2283_v33  ;;  %v1582_v38 = vld [vmem:[%s1878_s8 + $0x10] sm:$0xff] }
 0x143   : > { %v293_v2 = vpop.xlane.xlu1 %292  ;;  %v1556_v46 = vpop.eup %1555  ;;  %v597_v11 = vadd.f32 1e-05, %v565_v1  ;;  %v2321_v34 = vmul.f32 0.0078125, %v325_v63  ;;  %1306 = vmatprep.subr.mxu0 %v2319_v21  ;;  %v695_v41 = vmul.f32 %v1554_v56, %v663_v61  ;;  %v729_v29 = vmul.f32 %v1554_v56, %v2034_v49 }
 0x144   : > { %v581_v14 = vadd.f32 1e-05, %v549_v51  ;;  %v2323_v23 = vmul.f32 0.0078125, %v293_v2  ;;  %v679_v27 = vmul.f32 %v1556_v46, %v647_v31  ;;  %v822_v12 = vadd.f32 %v2092_v53, %v784_v57 }
 0x145   : > { %1561 = vrsqrt.f32 %v597_v11  ;;  %v761_v17 = vadd.f32 %v729_v29, %v695_v41  ;;  %v532_v32 = vmul.f32 %v2321_v34, %v2321_v34  ;;  %v713_v42 = vmul.f32 %v1556_v46, %v2037_v50  ;;  %v1584_v29 = vld [vmem:[%s1878_s8 + $0x8] sm:$0xff] }
 0x146   : > { %v516_v60 = vmul.f32 %v2323_v23, %v2323_v23  ;;  %1563 = vrsqrt.f32 %v581_v14  ;;  %v421_v58 = vpop.xlane.xlu0 %420  ;;  %1375 = vmatpush3.msra.mxu1 %v822_v12  ;;  %1307 = vmatpush3.xpose.msra.mxu0 %v822_v12  ;;  %v661_v56 = vsub.f32 0.0, %v2301_v24  ;;  %v645_v31 = vsub.f32 0.0, %v2303_v47  ;;  %v1583_v14 = vld [vmem:[%s1878_s8 + $0x88] sm:$0xff] }
 0x147   : > { %v389_v59 = vpop.xlane.xlu1 %388  ;;  %v500_v35 = vmul.f32 0.0078125, %v421_v58  ;;  %v799_v49 = vmul.f32 %v2084_v7, %v761_v17  ;;  %1376 = vmatprep.subr.mxu1 %v1731_v26  ;;  %v745_v48 = vadd.f32 %v713_v42, %v679_v27  ;;  %v660_v58 = vsub.f32 0.0, %v2321_v34 }
 0x148   : > { %v484_v43 = vmul.f32 0.0078125, %v389_v59 }
 0x149   : > { %v564_v6 = vsub.f32 %v500_v35, %v532_v32  ;;  %v2339_v36 = vadd.f32 %v2092_v53, %v799_v49  ;;  %v783_v52 = vmul.f32 %v2084_v7, %v745_v48  ;;  %v644_v32 = vsub.f32 0.0, %v2323_v23  ;;  %v1585_v49 = vld [vmem:[%s1878_s8 + $0x80] sm:$0xff] }
 0x14a   : > { %v548_v37 = vsub.f32 %v484_v43, %v516_v60  ;;  %v1558_v44 = vpop.eup %1557 }
 0x14b   : > { %v1560_v50 = vpop.eup %1559  ;;  %v596_v40 = vadd.f32 1e-05, %v564_v6  ;;  %v694_v19 = vmul.f32 %v1558_v44, %v662_v30  ;;  %1308 = vmatprep.subr.mxu0 %v2339_v36  ;;  %v728_v3 = vmul.f32 %v1581_v28, %v1558_v44  ;;  %v821_v45 = vadd.f32 %v2092_v53, %v783_v52 }
 0x14c   : > { %v580_v15 = vadd.f32 1e-05, %v548_v37  ;;  %v678_v25 = vmul.f32 %v1560_v50, %v646_v13  ;;  %v712_v55 = vmul.f32 %v1582_v38, %v1560_v50  ;;  %v1586_v37 = vld [vmem:[%s1878_s8] sm:$0xff]  ;;  %v1733_v28 = vmov 0  }
 0x14d   : > { %1565 = vrsqrt.f32 %v596_v40  ;;  %v760_v33 = vadd.f32 %v728_v3, %v694_v19  ;;  %1377 = vmatpush3.msra.mxu1 %v821_v45  ;;  %1309 = vmatpush3.xpose.msra.mxu0 %v821_v45 }
 0x14e   : > { %1567 = vrsqrt.f32 %v580_v15  ;;  %v744_v1 = vadd.f32 %v712_v55, %v678_v25  ;;  %1378 = vmatprep.subr.mxu1 %v1731_v26  ;;  %v1732_v15 = vmov -inf   ;;  %1503 = vset.pattern.permute.xlu0 %v1733_v28 }
 0x14f   : > { %v798_v51 = vmul.f32 %v2084_v7, %v760_v33  ;;  %254 = vst.msk [vmem:[#allocation2] sm:$0xff] %vm253_vm0, %v1732_v15  ;;  %255 = vst.msk [vmem:[#allocation2 + $0x8] sm:$0xff] %vm253_vm0, %v1732_v15  ;;  %1504 = vset.pattern.permute.xlu1 %v1733_v28 }
 0x150   : > { %v782_v5 = vmul.f32 %v2084_v7, %v744_v1 }
 0x151   : > { %v2352_v63 = vadd.f32 %v2092_v53, %v798_v51 }
 0x152   : > { %v1562_v61 = vpop.eup %1561  ;;  %v820_v2 = vadd.f32 %v2092_v53, %v782_v5 }
 0x153   : > { %v1564_v46 = vpop.eup %1563  ;;  %v693_v11 = vmul.f32 %v1562_v61, %v661_v56  ;;  %v727_v57 = vmul.f32 %v1583_v14, %v1562_v61  ;;  %1310 = vmatprep.subr.mxu0 %v2352_v63 }
 0x154   : > { %1379 = vmatpush3.msra.mxu1 %v820_v2  ;;  %v677_v41 = vmul.f32 %v1564_v46, %v645_v31  ;;  %v711_v60 = vmul.f32 %v1584_v29, %v1564_v46  ;;  %1311 = vmatpush3.xpose.msra.mxu0 %v820_v2 }
 0x155   : > { %1380 = vmatprep.subr.mxu1 %v1731_v26  ;;  %v759_v24 = vadd.f32 %v727_v57, %v693_v11 }
 0x156   : > { %v743_v47 = vadd.f32 %v711_v60, %v677_v41  ;;  %v1027_v25 = vld [vmem:[#allocation2 + $0x8] sm:$0xff] }
 0x157   : > { %v797_v27 = vmul.f32 %v2084_v7, %v759_v24 }
 0x158   : > { %v781_v12 = vmul.f32 %v2084_v7, %v743_v47 }
 0x159   : > { %v2363_v59 = vadd.f32 %v2092_v53, %v797_v27 }
 0x15a   : > { %v1566_v17 = vpop.eup %1565  ;;  %v819_v35 = vadd.f32 %v2092_v53, %v781_v12 }
 0x15b   : > { %v1568_v43 = vpop.eup %1567  ;;  %1312 = vmatprep.subr.mxu0 %v2363_v59  ;;  %v692_v42 = vmul.f32 %v1566_v17, %v660_v58  ;;  %v726_v30 = vmul.f32 %v1585_v49, %v1566_v17 }
 0x15c   : > { %1381 = vmatpush3.msra.mxu1 %v819_v35  ;;  %1313 = vmatpush3.xpose.msra.mxu0 %v819_v35  ;;  %v676_v6 = vmul.f32 %v1568_v43, %v644_v32  ;;  %v710_v48 = vmul.f32 %v1586_v37, %v1568_v43 }
 0x15d   : > { %1382 = vmatprep.subr.mxu1 %v1731_v26  ;;  %v758_v34 = vadd.f32 %v726_v30, %v692_v42 }
 0x15e   : > { %v742_v44 = vadd.f32 %v710_v48, %v676_v6 }
 0x15f   : > { %v796_v13 = vmul.f32 %v2084_v7, %v758_v34 }
 0x160   : > { %v780_v23 = vmul.f32 %v2084_v7, %v742_v44 }
 0x161   : > { %v2374_v50 = vadd.f32 %v2092_v53, %v796_v13 }
 0x162   : > { %v818_v40 = vadd.f32 %v2092_v53, %v780_v23 }
 0x163   : > { %1314 = vmatprep.subr.mxu0 %v2374_v50 }
 0x164   : > { %1383 = vmatpush3.msra.mxu1 %v818_v40  ;;  %1315 = vmatpush3.xpose.msra.mxu0 %v818_v40 }
 0x165   : > { %1387 = vmatprep.subr.mxu1 %v1731_v26 }
 0x167   : > { %1317 = vmatmul.mubr.f32.vlgmr.msra.gmra.mxu0 %v2076_v39  ;;  %v924_v39 = vld [vmem:[#allocation2] sm:$0xff] }
 0x227   : > { %v917_v7 = vpop.f32.mrf.mxu0 }
 0x228   : > { %v922_v53 = vmul.f32 0.088388346, %v917_v7 }
 0x229   : > { %v919_v52 = vpop.f32.mrf.mxu0 }
 0x22a   : > { %v923_v19 = vmul.f32 0.088388346, %v919_v52  ;;  %925 = vmax.xlane.f32.xlu0 %v922_v53 }
 0x22c   : > { %1028 = vmax.xlane.f32.xlu1 %v923_v19 }
 0x2b3   : > { %v926_v3 = vpop.xlane.xlu0 %925 }
 0x2b4   : > { %v927_v38 = vmax.f32 %v924_v39, %v926_v3 }
 0x2b5   : > { %v1029_v55 = vpop.xlane.xlu1 %1028 }
 0x2b6   : > { %v928_v45 = vsub.f32 %v924_v39, %v927_v38  ;;  %1025 = vst.msk [vmem:[#allocation2] sm:$0xff] %vm253_vm0, %v927_v38  ;;  %v1030_v33 = vmax.f32 %v1027_v25, %v1029_v55  ;;  %933 = vperm.xlu0 %1503, %v927_v38  }
 0x2b8   : > { %v1031_v1 = vsub.f32 %v1027_v25, %v1030_v33  ;;  %1129 = vst.msk [vmem:[#allocation2 + $0x8] sm:$0xff] %vm253_vm0, %v1030_v33  ;;  %1036 = vperm.xlu1 %1504, %v1030_v33   ;;  %v929_v11 = vmul.f32 1.442695, %v928_v45 }
 0x2ba   : > { %v1032_v57 = vmul.f32 1.442695, %v1031_v1 }
 0x331   : > { %v934_v51 = vpop.permute.xlu0 %933 }
 0x332   : > { %v936_v5 = vsub.f32 %v922_v53, %v934_v51 }
 0x333   : > { %v1037_v56 = vpop.permute.xlu1 %1036 }
 0x334   : > { %v937_v61 = vmul.f32 1.442695, %v936_v5  ;;  %v1039_v31 = vsub.f32 %v923_v19, %v1037_v56 }
 0x336   : > { %1569 = vpow2.f32 %v937_v61  ;;  %v1040_v2 = vmul.f32 1.442695, %v1039_v31 }
 0x338   : > { %1571 = vpow2.f32 %v1040_v2 }
 0x339   : > { %1573 = vpow2.f32 %v929_v11 }
 0x33a   : > { %1575 = vpow2.f32 %v1032_v57 }
 0x343   : > { %v1570_v46 = vpop.eup %1569 }
 0x344   : > { %941 = vadd.xlane.f32.xlu1 %v1570_v46  ;;  %1385 = vmatmul.mubr.f32.vlgmr.msra.gmra.mxu1 %v1570_v46 }
 0x345   : > { %v1572_v14 = vpop.eup %1571  ;;  %1388 = vmatpush3.msra.mxu1 %v2099_v10  ;;  %1419 = vmatprep.mubr.msk.f32.mxu1 %vm1734_vm1, %v1731_v26 }
 0x346   : > { %1389 = vmatprep.subr.mxu1 %v1731_v26  ;;  %1045 = vadd.xlane.f32.xlu0 %v1572_v14  ;;  %v1574_v10 = vpop.eup %1573 }
 0x347   : > { %1390 = vmatpush3.msra.mxu1 %v2119_v62  ;;  %v1576_v62 = vpop.eup %1575 }
 0x348   : > { %1391 = vmatprep.subr.mxu1 %v1731_v26 }
 0x349   : > { %1392 = vmatpush3.msra.mxu1 %v2139_v54  ;;  %v939_v54 = vld [vmem:[#allocation3] sm:$0xff] }
 0x34a   : > { %1393 = vmatprep.subr.mxu1 %v1731_v26 }
 0x34b   : > { %1394 = vmatpush3.msra.mxu1 %v2159_v0  ;;  %v1043_v0 = vld [vmem:[#allocation3 + $0x8] sm:$0xff] }
 0x34c   : > { %1395 = vmatprep.subr.mxu1 %v1731_v26 }
 0x34d   : > { %1396 = vmatpush3.msra.mxu1 %v2179_v22  ;;  %v940_v22 = vmul.f32 %v1574_v10, %v939_v54 }
 0x34e   : > { %1397 = vmatprep.subr.mxu1 %v1731_v26 }
 0x34f   : > { %1398 = vmatpush3.msra.mxu1 %v2199_v16 }
 0x350   : > { %1399 = vmatprep.subr.mxu1 %v1731_v26 }
 0x351   : > { %1400 = vmatpush3.msra.mxu1 %v2219_v9 }
 0x352   : > { %1401 = vmatprep.subr.mxu1 %v1731_v26 }
 0x353   : > { %1402 = vmatpush3.msra.mxu1 %v2239_v4  ;;  %v1044_v4 = vmul.f32 %v1576_v62, %v1043_v0 }
 0x354   : > { %1403 = vmatprep.subr.mxu1 %v1731_v26 }
 0x355   : > { %1404 = vmatpush3.msra.mxu1 %v2259_v18  ;;  %949 = vperm.xlu1 %1504, %v1574_v10  }
 0x356   : > { %1405 = vmatprep.subr.mxu1 %v1731_v26 }
 0x357   : > { %1406 = vmatpush3.msra.mxu1 %v2279_v20 }
 0x358   : > { %1407 = vmatprep.subr.mxu1 %v1731_v26 }
 0x359   : > { %1408 = vmatpush3.msra.mxu1 %v2299_v8 }
 0x35a   : > { %1409 = vmatprep.subr.mxu1 %v1731_v26 }
 0x35b   : > { %1410 = vmatpush3.msra.mxu1 %v2319_v21 }
 0x35c   : > { %1411 = vmatprep.subr.mxu1 %v1731_v26  ;;  %1053 = vperm.xlu0 %1503, %v1576_v62  }
 0x35d   : > { %1412 = vmatpush3.msra.mxu1 %v2339_v36 }
 0x35e   : > { %1413 = vmatprep.subr.mxu1 %v1731_v26 }
 0x35f   : > { %1414 = vmatpush3.msra.mxu1 %v2352_v63 }
 0x360   : > { %1415 = vmatprep.subr.mxu1 %v1731_v26 }
 0x361   : > { %1416 = vmatpush3.msra.mxu1 %v2363_v59 }
 0x362   : > { %1417 = vmatprep.subr.mxu1 %v1731_v26 }
 0x363   : > { %1418 = vmatpush3.msra.mxu1 %v2374_v50 }
 0x364   : > { %1420 = vmatmul.mubr.f32.vlgmr.msra.gmra.mxu1 %v1572_v14 }
 0x3cd   : > { %v942_v16 = vpop.xlane.xlu1 %941 }
 0x3ce   : > { %v943_v9 = vadd.f32 %v942_v16, %v940_v22 }
 0x3cf   : > { %v1046_v18 = vpop.xlane.xlu0 %1045 }
 0x3d0   : > { %945 = vst.msk [vmem:[#allocation3] sm:$0xff] %vm253_vm0, %v943_v9  ;;  %v1047_v20 = vadd.f32 %v1046_v18, %v1044_v4 }
 0x3d1   : > { %v950_v29 = vpop.permute.xlu1 %949 }
 0x3d2   : > { %1048 = vst.msk [vmem:[#allocation3 + $0x8] sm:$0xff] %vm253_vm0, %v1047_v20  ;;  %v952_v47 = vmul.f32 0.0, %v950_v29 }
 0x3d7   : > { %v1135_v8 = vld [vmem:[#allocation3] sm:$0xff]  ;;  %v1054_v27 = vpop.permute.xlu0 %1053 }
 0x3d8   : > { %1139 = vperm.xlu1 %1504, %v1135_v8   ;;  %v1056_v59 = vmul.f32 0.0, %v1054_v27 }
 0x3d9   : > { %v1136_v21 = vld [vmem:[#allocation3 + $0x8] sm:$0xff] }
 0x3dc   : > { %1144 = vperm.xlu1 %1504, %v1136_v21  }
 0x404   : > { %v1019_v26 = vpop.f32.mrf.mxu1 }
 0x405   : > { %v1023_v12 = vadd.f32 %v1019_v26, %v952_v47 }
 0x406   : > { %v1386_v36 = vpop.f32.mrf.mxu1 }
 0x424   : > { %v1123_v63 = vpop.f32.mrf.mxu1 }
 0x425   : > { %v1127_v32 = vadd.f32 %v1123_v63, %v1056_v59 }
 0x426   : > { %v1421_v41 = vpop.f32.mrf.mxu1 }
 0x453   : > { %v1140_v60 = vpop.permute.xlu1 %1139 }
 0x454   : > { %1577 = vrcp.f32 %v1140_v60 }
 0x457   : > { %v1145_v24 = vpop.permute.xlu1 %1144 }
 0x458   : > { %1579 = vrcp.f32 %v1145_v24 }
 0x461   : > { %v1578_v58 = vpop.eup %1577 }
 0x462   : > { %v1148_v17 = vmul.f32 %v1578_v58, %v1023_v12 }
 0x464   : > { %1151 = vst [vmem:[%s245_s30] sm:$0xff] %v1148_v17 }
 0x465   : > { %v1580_v35 = vpop.eup %1579 }
 0x466   : > { %v1150_v43 = vmul.f32 %v1580_v35, %v1127_v32 }
 0x468   : > { %1152 = vst [vmem:[%s245_s30 + $0x8] sm:$0xff] %v1150_v43 }
 0x469   : > { %1654 = shalt.err (!%p1651_p9)
}
 0x46a   : > { %s1655_s21 = scalar_lea.hbm %s2430_s5, 256  ;;  %s1659_s26 = scalar_lea.hbm %s2484_s4, 512 }
 0x46b   : > { %p1656_p0 = scmp.ne.s32.totalorder %s2430_s5, %s1655_s21  ;;  %p1660_p10 = scmp.lt.s32.totalorder %s2430_s5, %s2484_s4 }
 0x46c   : > { %p1661_p11 = scmp.lt.s32.totalorder %s1659_s26, %s1655_s21 }
 0x46d   : > { %p1657_p2 = pnand %p1656_p0, %p2500_p13 }
 0x46e   : > { %p1662_p5 = por %p1661_p11, %p1660_p10 }
 0x46f   : > { %p1658_p6 = pneg %p1657_p2 }
 0x471   : > { %p1663_p3 = pnand %p1662_p5, %p1658_p6 }
 0x473   : > { %1666 = shalt.err (!%p1663_p3)
}
 0x474   : > { %s1736_s22 = smov 128   ;;  %s1737_s25 = smov 8  }
 0x475   : > { %1428 = dma.vmem_to_hbm [thread:$0]  (%p2500_p13), %s2432_s7, 256, %s2430_s5, %s1154_s14, %s1736_s22, %s1736_s22, %s1737_s25  }
 0x476 PF: > { %s1182_s30 = sand.u32 1, %s1705_s15   ;;  %p2501_p4 = scmp.ne.s32.totalorder %s2493_s28, 0 }
 0x477   : > { %p2502_p1 = scmp.ge.s32.totalorder %s1725_s20, 2  ;;  %s1183_s10 = scalar_lea.sflag [#allocation7], %s1182_s30 }
 0x479   : > { %p1439_p12 = pnand %p2502_p1, %p2501_p4 }
 0x47b   : > { %p1440_p7 = pneg %p1439_p12 }
 0x47d   : > { %1700 = dma.done.wait (%p1440_p7), %s1183_s10, 256  }
 0x47e   : > { %1702 = vsyncadd (%p1440_p7), %s1183_s10, 4294967040  ;;  %s21_s20 = sadd.s32 1, %s1725_s20   ;;  %s2503_s27 = sld [smem:[#allocation14_spill]] }
 0x47f   : > { %p18_p8 = scmp.ge.s32.totalorder %s21_s20, 4   ;;  %s2504_s15 = smov %s1709_s16 }
 0x480   : > { %s2505_s16 = smov %s1713_s17  ;;  %s2506_s17 = smov %s1865_s11 }
 0x481   : > { %s2507_s18 = smov %s1721_s19  ;;  %20 = sbr.rel (!%p18_p8) target bundleno = 9 (0x9), region = 96 }
 0x484   : > { %s2508_s19 = smov %s2503_s27 }
 0x486   :  { %1188 = vsyncpa [#allocation6], 1 }
 0x487   :  { %1190 = vsyncpa [#allocation6 + $0x1], 1 }
 0x488   :  { %1191 = vsyncpa [#allocation9], 1 }
 0x489   :  { %1192 = vsyncpa [#allocation7], 1 }
 0x48a   :  { %1194 = vsyncpa [#allocation7 + $0x1], 1 }

</bundles_post_ra>
